<compile_context>
chip_gen: v7x
topology: tpu7x:2x2x1
jax: 0.10.0
libtpu: 0.0.40
codegen_flags: <defaults>
</compile_context>

<pallas_src>
import functools

import jax
import jax.numpy as jnp
from jax.experimental import pallas as pl
from jax.experimental.pallas import tpu as pltpu

# ----------------------------------------------------------------------------
# Model hyper-parameters (small, deterministic, consistent with the module)
# ----------------------------------------------------------------------------
TEXT_SPECS = {"title": (50, 16), "body": (80, 32)}          # name -> (vocab, embed_dim)
TEXT_CNN_CONFIGS = {"title": {"n_filters": 32, "filter_size": 3},
                    "body": {"n_filters": 64, "filter_size": 5}}
CATEGORICAL_SPECS = {"color": (10, 8), "brand": (12, 8)}     # name -> (cardinality, embed_dim)
NUM_NUMERICAL_FEATURES = 6
NUMERICAL_HIDDEN_SIZE = 16
HIDDEN_SIZE = 32
NUM_CLASSES = 5
PAD_OUT = 128                                                # lane-dense padded output width

BATCH = 8
SEQ_LEN = 16

_VMEM = pl.BlockSpec(memory_space=pltpu.MemorySpace.VMEM)


# ----------------------------------------------------------------------------
# Fused kernel: gathers + convs + pools + MLP, all in one invocation
# ----------------------------------------------------------------------------
def fused_kernel(title_idx_ref, body_idx_ref, cat_idx_ref, num_ref,
                 pk_ref, body_w_ref, out_ref, *, offs):
    B = title_idx_ref.shape[0]

    def win(name):
        r0, r, c = offs[name]                 # static python ints -> aligned window load
        return pk_ref[r0:r0 + r, 0:c]

    def text_branch(idx, table, conv_w2d, conv_b, K, F):
        b, l = idx.shape
        V = table.shape[0]
        Lout = l - K + 1
        # embedding gather as one-hot matmul on the MXU
        oh = (idx[:, :, None] ==
              jax.lax.broadcasted_iota(jnp.int32, (b, l, V), 2)).astype(jnp.float32)
        emb = jax.lax.dot_general(oh, table, (((2,), (0,)), ((), ())),
                                  preferred_element_type=jnp.float32)      # (B, L, E)
        # conv as one lane-dense matmul, then K shifted adds of the output
        proj = jax.lax.dot_general(emb, conv_w2d, (((2,), (0,)), ((), ())),
                                   preferred_element_type=jnp.float32)     # (B, L, K*F)
        acc = proj[:, 0:Lout, 0:F]
        for k in range(1, K):
            acc = acc + proj[:, k:k + Lout, k * F:(k + 1) * F]
        acc = jnp.maximum(acc + conv_b.reshape(1, 1, F), 0.0)              # bias + ReLU
        return jnp.max(acc, axis=1)                                        # full-length max pool

    title_pool = text_branch(title_idx_ref[...], win("title_emb"), win("title_conv_w"),
                             win("title_conv_b"),
                             TEXT_CNN_CONFIGS["title"]["filter_size"],
                             TEXT_CNN_CONFIGS["title"]["n_filters"])
    body_pool = text_branch(body_idx_ref[...], win("body_emb"), body_w_ref[...],
                            win("body_conv_b"),
                            TEXT_CNN_CONFIGS["body"]["filter_size"],
                            TEXT_CNN_CONFIGS["body"]["n_filters"])

    # categorical: combined one-hot @ block-diagonal table -> [color_emb | brand_emb]
    cat_idx = cat_idx_ref[...]                                             # (B, n_cat) int32
    cat_table = win("cat_table")                                           # (sum_card, sum_edim)
    Vtot = cat_table.shape[0]
    oh_cat = None
    off = 0
    for j, (_, (card, _)) in enumerate(CATEGORICAL_SPECS.items()):
        part = ((cat_idx[:, j:j + 1] + off) ==
                jax.lax.broadcasted_iota(jnp.int32, (B, Vtot), 1)).astype(jnp.float32)
        oh_cat = part if oh_cat is None else oh_cat + part
        off += card
    cat_feat = jnp.dot(oh_cat, cat_table, preferred_element_type=jnp.float32)  # (B, 16)

    # numerical Linear + ReLU
    num_h = jnp.dot(num_ref[...], win("num_w"),
                    preferred_element_type=jnp.float32) + win("num_b")
    num_h = jnp.maximum(num_h, 0.0)

    # fusion MLP: single 128-wide contraction, lane-dense padded output
    feats = jnp.concatenate([title_pool, body_pool, cat_feat, num_h], axis=1)   # (B, 128)
    h = jnp.dot(feats, win("fus_w1"), preferred_element_type=jnp.float32) + win("fus_b1")
    h = jnp.maximum(h, 0.0)
    # TODO(synk): nn.Dropout is identity at inference time; not applied here.
    out_ref[...] = (jnp.dot(h, win("fus_w2"), preferred_element_type=jnp.float32)
                    + win("fus_b2"))


@functools.partial(jax.jit, static_argnames=("offs",))
def _forward_impl(pk, body_w, text_inputs, categorical_inputs, numerical_inputs, *, offs):
    offs_d = dict(offs)
    cat_idx = jnp.stack([c.astype(jnp.int32) for c in categorical_inputs], axis=1)   # (B, n_cat)
    num = jnp.stack(numerical_inputs, axis=1).astype(jnp.float32)                    # (B, n_num)
    B = text_inputs[0].shape[0]
    out = pl.pallas_call(
        functools.partial(fused_kernel, offs=offs_d),
        out_shape=jax.ShapeDtypeStruct((B, PAD_OUT), jnp.float32),
        in_specs=[_VMEM] * 6,
        out_specs=_VMEM,
    )(text_inputs[0], text_inputs[1], cat_idx, num, pk, body_w)
    return out[:, :NUM_CLASSES]


def forward(packed, text_inputs, categorical_inputs, numerical_inputs):
    pk, body_w, offs = packed
    offs_t = tuple(sorted(offs.items()))
    return _forward_impl(pk, body_w, list(text_inputs), list(categorical_inputs),
                         list(numerical_inputs), offs=offs_t)


# ----------------------------------------------------------------------------
# Parameter init (canonical layout) + packing into VMEM-friendly buffers
# ----------------------------------------------------------------------------
def init_params(key):
    keys = iter(jax.random.split(key, 32))
    p = {"text_emb": {}, "conv_w": {}, "conv_b": {}, "cat_emb": {}}
    for name, (vocab, edim) in TEXT_SPECS.items():
        p["text_emb"][name] = 0.1 * jax.random.normal(next(keys), (vocab, edim), jnp.float32)
        F = TEXT_CNN_CONFIGS[name]["n_filters"]
        K = TEXT_CNN_CONFIGS[name]["filter_size"]
        p["conv_w"][name] = 0.1 * jax.random.normal(next(keys), (K, edim, F), jnp.float32)
        p["conv_b"][name] = 0.1 * jax.random.normal(next(keys), (1, F), jnp.float32)
    for name, (card, edim) in CATEGORICAL_SPECS.items():
        p["cat_emb"][name] = 0.1 * jax.random.normal(next(keys), (card, edim), jnp.float32)

    p["num_w"] = 0.1 * jax.random.normal(
        next(keys), (NUM_NUMERICAL_FEATURES, NUMERICAL_HIDDEN_SIZE), jnp.float32)
    p["num_b"] = 0.1 * jax.random.normal(next(keys), (1, NUMERICAL_HIDDEN_SIZE), jnp.float32)

    fusion_dim = (sum(c["n_filters"] for c in TEXT_CNN_CONFIGS.values())
                  + sum(e for _, e in CATEGORICAL_SPECS.values())
                  + NUMERICAL_HIDDEN_SIZE)
    p["fus_w1"] = 0.1 * jax.random.normal(next(keys), (fusion_dim, HIDDEN_SIZE), jnp.float32)
    p["fus_b1"] = 0.1 * jax.random.normal(next(keys), (1, HIDDEN_SIZE), jnp.float32)
    p["fus_w2"] = 0.1 * jax.random.normal(next(keys), (HIDDEN_SIZE, NUM_CLASSES), jnp.float32)
    p["fus_b2"] = 0.1 * jax.random.normal(next(keys), (1, NUM_CLASSES), jnp.float32)
    return p


def pack_params(params):
    """Pack params into one (rows, 128) f32 buffer with 8-row-aligned entries,
    plus the wide (E, K*F)=(32,320) body conv weight as a second buffer."""
    entries = {}

    entries["title_emb"] = params["text_emb"]["title"]
    entries["body_emb"] = params["text_emb"]["body"]

    # block-diagonal categorical table: one-hot @ table == concat of embeddings
    cards = [c for c, _ in CATEGORICAL_SPECS.values()]
    edims = [e for _, e in CATEGORICAL_SPECS.values()]
    cat_table = jnp.zeros((sum(cards), sum(edims)), jnp.float32)
    r = c = 0
    for name, (card, edim) in CATEGORICAL_SPECS.items():
        cat_table = cat_table.at[r:r + card, c:c + edim].set(params["cat_emb"][name])
        r += card
        c += edim
    entries["cat_table"] = cat_table

    kt, et, ft = params["conv_w"]["title"].shape
    entries["title_conv_w"] = params["conv_w"]["title"].transpose(1, 0, 2).reshape(et, kt * ft)
    entries["title_conv_b"] = params["conv_b"]["title"]
    entries["body_conv_b"] = params["conv_b"]["body"]
    entries["num_w"] = params["num_w"]
    entries["num_b"] = params["num_b"]
    entries["fus_w1"] = params["fus_w1"]
    entries["fus_b1"] = params["fus_b1"]
    entries["fus_w2"] = jnp.zeros((HIDDEN_SIZE, PAD_OUT), jnp.float32).at[:, :NUM_CLASSES].set(
        params["fus_w2"])
    entries["fus_b2"] = jnp.zeros((1, PAD_OUT), jnp.float32).at[:, :NUM_CLASSES].set(
        params["fus_b2"])

    offs = {}
    row = 0
    for name, a in entries.items():
        rr, cc = a.shape
        offs[name] = (row, rr, cc)
        row += -(-rr // 8) * 8                      # next entry starts 8-row aligned
    rows = -(-row // 8) * 8
    pk = jnp.zeros((rows, PAD_OUT), jnp.float32)
    for name, a in entries.items():
        r0, rr, cc = offs[name]
        pk = pk.at[r0:r0 + rr, :cc].set(a.astype(jnp.float32))

    kb, eb, fb = params["conv_w"]["body"].shape
    body_w = params["conv_w"]["body"].transpose(1, 0, 2).reshape(eb, kb * fb)   # (32, 320)
    return pk, body_w, offs


# ----------------------------------------------------------------------------
# Pure-JAX reference mirroring the PyTorch forward exactly
# ----------------------------------------------------------------------------
def forward_ref(params, text_inputs, categorical_inputs, numerical_inputs):
    text_outs = []
    for i, name in enumerate(TEXT_SPECS):
        emb = jnp.take(params["text_emb"][name], text_inputs[i], axis=0)  # (B, L, E)
        K = TEXT_CNN_CONFIGS[name]["filter_size"]
        Lout = emb.shape[1] - K + 1
        acc = sum(jnp.einsum("ble,ef->blf", emb[:, k:k + Lout, :],
                             params["conv_w"][name][k]) for k in range(K))
        acc = jnp.maximum(acc + params["conv_b"][name].reshape(1, 1, -1), 0.0)
        text_outs.append(jnp.max(acc, axis=1))
    cat_outs = [jnp.take(params["cat_emb"][name], categorical_inputs[i], axis=0)
                for i, name in enumerate(CATEGORICAL_SPECS)]
    num_tensor = jnp.stack(numerical_inputs, axis=1).astype(jnp.float32)
    num_out = jnp.maximum(num_tensor @ params["num_w"] + params["num_b"], 0.0)
    feats = jnp.concatenate(text_outs + cat_outs + [num_out], axis=1)
    h = jnp.maximum(feats @ params["fus_w1"] + params["fus_b1"], 0.0)
    return h @ params["fus_w2"] + params["fus_b2"]


if __name__ == "__main__":
    key = jax.random.PRNGKey(0)
    pkey, dkey = jax.random.split(key)
    params = init_params(pkey)
    packed = pack_params(params)

    dkeys = iter(jax.random.split(dkey, 16))
    text_inputs = [
        jax.random.randint(next(dkeys), (BATCH, SEQ_LEN), 0, TEXT_SPECS[name][0], jnp.int32)
        for name in TEXT_SPECS
    ]
    categorical_inputs = [
        jax.random.randint(next(dkeys), (BATCH,), 0, CATEGORICAL_SPECS[name][0], jnp.int32)
        for name in CATEGORICAL_SPECS
    ]
    numerical_inputs = [
        jax.random.normal(next(dkeys), (BATCH,), jnp.float32)
        for _ in range(NUM_NUMERICAL_FEATURES)
    ]

    logits = forward(packed, text_inputs, categorical_inputs, numerical_inputs)
    logits = jax.block_until_ready(logits)
    assert logits.shape == (BATCH, NUM_CLASSES)

    ref = forward_ref(params, text_inputs, categorical_inputs, numerical_inputs)
    assert jnp.allclose(logits, ref, rtol=1e-4, atol=1e-4), "mismatch vs JAX reference"

    print("KERNEL_OK")
</pallas_src>

<mosaic_0001>
module attributes {stable_mosaic.version = 11 : i64} {
  func.func @fused_kernel(%arg0: memref<8x16xi32, #tpu.memory_space<vmem>>, %arg1: memref<8x16xi32, #tpu.memory_space<vmem>>, %arg2: memref<8x2xi32, #tpu.memory_space<vmem>>, %arg3: memref<8x6xf32, #tpu.memory_space<vmem>>, %arg4: memref<384x128xf32, #tpu.memory_space<vmem>>, %arg5: memref<32x320xf32, #tpu.memory_space<vmem>>, %arg6: memref<8x128xf32, #tpu.memory_space<vmem>>) attributes {dimension_semantics = [], scalar_prefetch = 0 : i64, scratch_operands = 0 : i64, tpu.core_type = #tpu.core_type<tc>} {
    %c0 = arith.constant 0 : index
    %c0_0 = arith.constant 0 : index
    %0 = vector.load %arg0[%c0, %c0_0] : memref<8x16xi32, #tpu.memory_space<vmem>>, vector<8x16xi32>
    %c0_1 = arith.constant 0 : index
    %c0_2 = arith.constant 0 : index
    %1 = vector.load %arg4[%c0_1, %c0_2] : memref<384x128xf32, #tpu.memory_space<vmem>>, vector<50x16xf32>
    %c160 = arith.constant 160 : index
    %c0_3 = arith.constant 0 : index
    %2 = vector.load %arg4[%c160, %c0_3] : memref<384x128xf32, #tpu.memory_space<vmem>>, vector<16x96xf32>
    %c176 = arith.constant 176 : index
    %c0_4 = arith.constant 0 : index
    %3 = vector.load %arg4[%c176, %c0_4] : memref<384x128xf32, #tpu.memory_space<vmem>>, vector<1x32xf32>
    %4 = vector.shape_cast %0 : vector<8x16xi32> to vector<8x16x1xi32>
    %5 = tpu.iota {dimensions = array<i32: 2>} : vector<8x16x50xi32>
    %6 = vector.broadcast %4 : vector<8x16x1xi32> to vector<8x16x50xi32>
    %7 = arith.cmpi eq, %6, %5 : vector<8x16x50xi32>
    %8 = arith.extui %7 : vector<8x16x50xi1> to vector<8x16x50xi32>
    %9 = arith.sitofp %8 : vector<8x16x50xi32> to vector<8x16x50xf32>
    %cst = arith.constant dense<0.000000e+00> : vector<8x16x16xf32>
    %10 = tpu.matmul %9, %1, %cst {dimension_numbers = #tpu.dot_dimension_numbers<[2], [0], [0, 1], [1], [0, 0, 0, 1, 1, 1], [], []>} : vector<8x16x50xf32>, vector<50x16xf32>, vector<8x16x16xf32> -> vector<8x16x16xf32>
    %cst_5 = arith.constant dense<0.000000e+00> : vector<8x16x96xf32>
    %11 = tpu.matmul %10, %2, %cst_5 {dimension_numbers = #tpu.dot_dimension_numbers<[2], [0], [0, 1], [1], [0, 0, 0, 1, 1, 1], [], []>} : vector<8x16x16xf32>, vector<16x96xf32>, vector<8x16x96xf32> -> vector<8x16x96xf32>
    %12 = vector.extract_strided_slice %11 {offsets = [0, 0, 0], sizes = [8, 14, 32], strides = [1, 1, 1]} : vector<8x16x96xf32> to vector<8x14x32xf32>
    %13 = vector.extract_strided_slice %11 {offsets = [0, 1, 32], sizes = [8, 14, 32], strides = [1, 1, 1]} : vector<8x16x96xf32> to vector<8x14x32xf32>
    %14 = arith.addf %12, %13 : vector<8x14x32xf32>
    %15 = vector.extract_strided_slice %11 {offsets = [0, 2, 64], sizes = [8, 14, 32], strides = [1, 1, 1]} : vector<8x16x96xf32> to vector<8x14x32xf32>
    %16 = arith.addf %14, %15 : vector<8x14x32xf32>
    %17 = vector.shape_cast %3 : vector<1x32xf32> to vector<1x1x32xf32>
    %18 = vector.broadcast %17 : vector<1x1x32xf32> to vector<8x14x32xf32>
    %19 = arith.addf %16, %18 : vector<8x14x32xf32>
    %cst_6 = arith.constant 0.000000e+00 : f32
    %20 = vector.broadcast %cst_6 : f32 to vector<8x14x32xf32>
    %21 = arith.maximumf %19, %20 : vector<8x14x32xf32>
    %cst_7 = arith.constant dense<0xFF800000> : vector<8x32xf32>
    %22 = vector.multi_reduction <maximumf>, %21, %cst_7 [1] : vector<8x14x32xf32> to vector<8x32xf32>
    %c0_8 = arith.constant 0 : index
    %c0_9 = arith.constant 0 : index
    %23 = vector.load %arg1[%c0_8, %c0_9] : memref<8x16xi32, #tpu.memory_space<vmem>>, vector<8x16xi32>
    %c56 = arith.constant 56 : index
    %c0_10 = arith.constant 0 : index
    %24 = vector.load %arg4[%c56, %c0_10] : memref<384x128xf32, #tpu.memory_space<vmem>>, vector<80x32xf32>
    %c0_11 = arith.constant 0 : index
    %c0_12 = arith.constant 0 : index
    %25 = vector.load %arg5[%c0_11, %c0_12] : memref<32x320xf32, #tpu.memory_space<vmem>>, vector<32x320xf32>
    %c184 = arith.constant 184 : index
    %c0_13 = arith.constant 0 : index
    %26 = vector.load %arg4[%c184, %c0_13] : memref<384x128xf32, #tpu.memory_space<vmem>>, vector<1x64xf32>
    %27 = vector.shape_cast %23 : vector<8x16xi32> to vector<8x16x1xi32>
    %28 = tpu.iota {dimensions = array<i32: 2>} : vector<8x16x80xi32>
    %29 = vector.broadcast %27 : vector<8x16x1xi32> to vector<8x16x80xi32>
    %30 = arith.cmpi eq, %29, %28 : vector<8x16x80xi32>
    %31 = arith.extui %30 : vector<8x16x80xi1> to vector<8x16x80xi32>
    %32 = arith.sitofp %31 : vector<8x16x80xi32> to vector<8x16x80xf32>
    %cst_14 = arith.constant dense<0.000000e+00> : vector<8x16x32xf32>
    %33 = tpu.matmul %32, %24, %cst_14 {dimension_numbers = #tpu.dot_dimension_numbers<[2], [0], [0, 1], [1], [0, 0, 0, 1, 1, 1], [], []>} : vector<8x16x80xf32>, vector<80x32xf32>, vector<8x16x32xf32> -> vector<8x16x32xf32>
    %cst_15 = arith.constant dense<0.000000e+00> : vector<8x16x320xf32>
    %34 = tpu.matmul %33, %25, %cst_15 {dimension_numbers = #tpu.dot_dimension_numbers<[2], [0], [0, 1], [1], [0, 0, 0, 1, 1, 1], [], []>} : vector<8x16x32xf32>, vector<32x320xf32>, vector<8x16x320xf32> -> vector<8x16x320xf32>
    %35 = vector.extract_strided_slice %34 {offsets = [0, 0, 0], sizes = [8, 12, 64], strides = [1, 1, 1]} : vector<8x16x320xf32> to vector<8x12x64xf32>
    %36 = vector.extract_strided_slice %34 {offsets = [0, 1, 64], sizes = [8, 12, 64], strides = [1, 1, 1]} : vector<8x16x320xf32> to vector<8x12x64xf32>
    %37 = arith.addf %35, %36 : vector<8x12x64xf32>
    %38 = vector.extract_strided_slice %34 {offsets = [0, 2, 128], sizes = [8, 12, 64], strides = [1, 1, 1]} : vector<8x16x320xf32> to vector<8x12x64xf32>
    %39 = arith.addf %37, %38 : vector<8x12x64xf32>
    %40 = vector.extract_strided_slice %34 {offsets = [0, 3, 192], sizes = [8, 12, 64], strides = [1, 1, 1]} : vector<8x16x320xf32> to vector<8x12x64xf32>
    %41 = arith.addf %39, %40 : vector<8x12x64xf32>
    %42 = vector.extract_strided_slice %34 {offsets = [0, 4, 256], sizes = [8, 12, 64], strides = [1, 1, 1]} : vector<8x16x320xf32> to vector<8x12x64xf32>
    %43 = arith.addf %41, %42 : vector<8x12x64xf32>
    %44 = vector.shape_cast %26 : vector<1x64xf32> to vector<1x1x64xf32>
    %45 = vector.broadcast %44 : vector<1x1x64xf32> to vector<8x12x64xf32>
    %46 = arith.addf %43, %45 : vector<8x12x64xf32>
    %cst_16 = arith.constant 0.000000e+00 : f32
    %47 = vector.broadcast %cst_16 : f32 to vector<8x12x64xf32>
    %48 = arith.maximumf %46, %47 : vector<8x12x64xf32>
    %cst_17 = arith.constant dense<0xFF800000> : vector<8x64xf32>
    %49 = vector.multi_reduction <maximumf>, %48, %cst_17 [1] : vector<8x12x64xf32> to vector<8x64xf32>
    %c0_18 = arith.constant 0 : index
    %c0_19 = arith.constant 0 : index
    %50 = vector.load %arg2[%c0_18, %c0_19] : memref<8x2xi32, #tpu.memory_space<vmem>>, vector<8x2xi32>
    %c136 = arith.constant 136 : index
    %c0_20 = arith.constant 0 : index
    %51 = vector.load %arg4[%c136, %c0_20] : memref<384x128xf32, #tpu.memory_space<vmem>>, vector<22x16xf32>
    %52 = vector.extract_strided_slice %50 {offsets = [0, 0], sizes = [8, 1], strides = [1, 1]} : vector<8x2xi32> to vector<8x1xi32>
    %c0_i32 = arith.constant 0 : i32
    %53 = vector.broadcast %c0_i32 : i32 to vector<8x1xi32>
    %54 = arith.addi %52, %53 : vector<8x1xi32>
    %55 = tpu.iota {dimensions = array<i32: 1>} : vector<8x22xi32>
    %56 = vector.broadcast %54 : vector<8x1xi32> to vector<8x22xi32>
    %57 = arith.cmpi eq, %56, %55 : vector<8x22xi32>
    %58 = arith.extui %57 : vector<8x22xi1> to vector<8x22xi32>
    %59 = arith.sitofp %58 : vector<8x22xi32> to vector<8x22xf32>
    %60 = vector.extract_strided_slice %50 {offsets = [0, 1], sizes = [8, 1], strides = [1, 1]} : vector<8x2xi32> to vector<8x1xi32>
    %c10_i32 = arith.constant 10 : i32
    %61 = vector.broadcast %c10_i32 : i32 to vector<8x1xi32>
    %62 = arith.addi %60, %61 : vector<8x1xi32>
    %63 = tpu.iota {dimensions = array<i32: 1>} : vector<8x22xi32>
    %64 = vector.broadcast %62 : vector<8x1xi32> to vector<8x22xi32>
    %65 = arith.cmpi eq, %64, %63 : vector<8x22xi32>
    %66 = arith.extui %65 : vector<8x22xi1> to vector<8x22xi32>
    %67 = arith.sitofp %66 : vector<8x22xi32> to vector<8x22xf32>
    %68 = arith.addf %59, %67 : vector<8x22xf32>
    %cst_21 = arith.constant dense<0.000000e+00> : vector<8x16xf32>
    %69 = tpu.matmul %68, %51, %cst_21 {dimension_numbers = #tpu.dot_dimension_numbers<[1], [0], [0], [1], [0, 0, 1, 1], [], []>} : vector<8x22xf32>, vector<22x16xf32>, vector<8x16xf32> -> vector<8x16xf32>
    %c0_22 = arith.constant 0 : index
    %c0_23 = arith.constant 0 : index
    %70 = vector.load %arg3[%c0_22, %c0_23] : memref<8x6xf32, #tpu.memory_space<vmem>>, vector<8x6xf32>
    %c192 = arith.constant 192 : index
    %c0_24 = arith.constant 0 : index
    %71 = vector.load %arg4[%c192, %c0_24] : memref<384x128xf32, #tpu.memory_space<vmem>>, vector<6x16xf32>
    %cst_25 = arith.constant dense<0.000000e+00> : vector<8x16xf32>
    %72 = tpu.matmul %70, %71, %cst_25 {dimension_numbers = #tpu.dot_dimension_numbers<[1], [0], [0], [1], [0, 0, 1, 1], [], []>} : vector<8x6xf32>, vector<6x16xf32>, vector<8x16xf32> -> vector<8x16xf32>
    %c200 = arith.constant 200 : index
    %c0_26 = arith.constant 0 : index
    %73 = vector.load %arg4[%c200, %c0_26] : memref<384x128xf32, #tpu.memory_space<vmem>>, vector<1x16xf32>
    %74 = vector.broadcast %73 : vector<1x16xf32> to vector<8x16xf32>
    %75 = arith.addf %72, %74 : vector<8x16xf32>
    %cst_27 = arith.constant 0.000000e+00 : f32
    %76 = vector.broadcast %cst_27 : f32 to vector<8x16xf32>
    %77 = arith.maximumf %75, %76 : vector<8x16xf32>
    %78 = tpu.concatenate %22, %49, %69, %77 in 1 : vector<8x32xf32>, vector<8x64xf32>, vector<8x16xf32>, vector<8x16xf32> -> vector<8x128xf32>
    %c208 = arith.constant 208 : index
    %c0_28 = arith.constant 0 : index
    %79 = vector.load %arg4[%c208, %c0_28] : memref<384x128xf32, #tpu.memory_space<vmem>>, vector<128x32xf32>
    %cst_29 = arith.constant dense<0.000000e+00> : vector<8x32xf32>
    %80 = tpu.matmul %78, %79, %cst_29 {dimension_numbers = #tpu.dot_dimension_numbers<[1], [0], [0], [1], [0, 0, 1, 1], [], []>} : vector<8x128xf32>, vector<128x32xf32>, vector<8x32xf32> -> vector<8x32xf32>
    %c336 = arith.constant 336 : index
    %c0_30 = arith.constant 0 : index
    %81 = vector.load %arg4[%c336, %c0_30] : memref<384x128xf32, #tpu.memory_space<vmem>>, vector<1x32xf32>
    %82 = vector.broadcast %81 : vector<1x32xf32> to vector<8x32xf32>
    %83 = arith.addf %80, %82 : vector<8x32xf32>
    %cst_31 = arith.constant 0.000000e+00 : f32
    %84 = vector.broadcast %cst_31 : f32 to vector<8x32xf32>
    %85 = arith.maximumf %83, %84 : vector<8x32xf32>
    %c344 = arith.constant 344 : index
    %c0_32 = arith.constant 0 : index
    %86 = vector.load %arg4[%c344, %c0_32] : memref<384x128xf32, #tpu.memory_space<vmem>>, vector<32x128xf32>
    %cst_33 = arith.constant dense<0.000000e+00> : vector<8x128xf32>
    %87 = tpu.matmul %85, %86, %cst_33 {dimension_numbers = #tpu.dot_dimension_numbers<[1], [0], [0], [1], [0, 0, 1, 1], [], []>} : vector<8x32xf32>, vector<32x128xf32>, vector<8x128xf32> -> vector<8x128xf32>
    %c376 = arith.constant 376 : index
    %c0_34 = arith.constant 0 : index
    %88 = vector.load %arg4[%c376, %c0_34] : memref<384x128xf32, #tpu.memory_space<vmem>>, vector<1x128xf32>
    %89 = vector.broadcast %88 : vector<1x128xf32> to vector<8x128xf32>
    %90 = arith.addf %87, %89 : vector<8x128xf32>
    %c0_35 = arith.constant 0 : index
    %c0_36 = arith.constant 0 : index
    %91 = vector.load %arg6[%c0_35, %c0_36] : memref<8x128xf32, #tpu.memory_space<vmem>>, vector<8x128xf32>
    tpu.vector_store %arg6[%c0_35, %c0_36], %90 {strides = array<i32>} : memref<8x128xf32, #tpu.memory_space<vmem>>, vector<8x128xf32>,
    return
  }
}

</mosaic_0001>

<bundles_post_ra>
// kernel: _forward_impl.1
= control target key start
LH: loop header
LB: loop body
LE: loop exit
PB: predicated region body
PF: predicated region fallthrough
CT: control target
= control target key end

     0   :  { %11 = vsyncpa [#allocation3], 0  ;;  %s4004_s0 = inlined_call_operand.vmem [shape: s32[8,16], index: 0, kind: input, shape index: {}]   ;;  %s4005_s1 = inlined_call_operand.vmem [shape: s32[8,16], index: 1, kind: input, shape index: {}]   ;;  %s4006_s2 = inlined_call_operand.vmem [shape: s32[8,2], index: 2, kind: input, shape index: {}]   ;;  %s4007_s3 = inlined_call_operand.vmem [shape: f32[8,6], index: 3, kind: input, shape index: {}]   ;;  %s4008_s4 = inlined_call_operand.hbm [shape: f32[384,128], index: 4, kind: input, shape index: {}]   ;;  %s4009_s5 = inlined_call_operand.vmem [shape: f32[32,320], index: 5, kind: input, shape index: {}]   ;;  %s4010_s6 = inlined_call_operand.hbm [shape: f32[8,128], index: 6, kind: output, shape index: {}]  }
   0x1   :  { %12 = vsyncpa [#allocation4], 0  ;;  %s3054_s21 = smov [#allocation2]   ;;  %s3006_s25 = scalar_lea.hbm %s4008_s4, 6144 }
   0x2   :  { %s26_s22 = sshll.u32 %s3054_s21, 4  ;;  %p3007_p0 = scmp.ne.s32.totalorder %s4008_s4, %s3006_s25  ;;  %s27_s22 = int_to_ptr.vmem [resolvable:$true] %s26_s22 }
   0x3   :  { %p3010_p1 = scmp.lt.u32.totalorder %s3006_s25, %s4008_s4 }
   0x5   :  { %p3012_p2 = pnand %p3010_p1, %p3007_p0 }
   0x7   :  { %3015 = shalt.err (!%p3012_p2)
}
   0x8   :  { %s3016_s30 = scalar_lea.vmem %s27_s22, 6144  ;;  %p3021_p4 = scmp.lt.s32.totalorder %s27_s22, %s27_s22 }
   0x9   :  { %p3017_p3 = scmp.ne.s32.totalorder %s27_s22, %s3016_s30  ;;  %p3022_p5 = scmp.lt.s32.totalorder %s3016_s30, %s3016_s30 }
   0xb   :  { %p3023_p6 = por %p3022_p5, %p3021_p4 }
   0xd   :  { %p3024_p7 = pnand %p3023_p6, %p3017_p3 }
   0xf   :  { %3027 = shalt.err (!%p3024_p7)
}
  0x10   :  { %s3055_s7 = smov 128   ;;  %s3056_s8 = smov 8  }
  0x11   :  { %32 = dma.hbm_to_vmem [thread:$0]  %s4008_s4, 6144, %s27_s22, [#allocation3], %s3055_s7, %s3055_s7, %s3056_s8  }
  0x12   :  { %3050 = dma.done.wait [#allocation3], 6144  }
  0x13   :  { %3051 = vsyncadd [#allocation3], 4294961152  ;;  %v49_v0 = vlaneseq  ;;  %v38_v4 = vld [vmem:[%s4004_s0] sm:$0xff]  ;;  %v40_v6 = vld [vmem:[#allocation2 + $0x8] sm:$0xff]  ;;  %vm236_vm0 = vcmask 1041408   ;;  %vm187_vm1 = vcmask 408576  }
  0x14   :  { %v39_v5 = vld [vmem:[#allocation2] sm:$0xff]  ;;  %v41_v9 = vld [vmem:[#allocation2 + $0x10] sm:$0xff]  ;;  %v42_v10 = vld [vmem:[#allocation2 + $0x18] sm:$0xff]  ;;  %v3057_v44 = vmov 0.0   ;;  %s3065_s13 = smov 112  }
  0x15   :  { %v3115_v1 = vshrl.u32 %v49_v0, 7  ;;  %v2905_v12 = vpack.c.bf16 %v40_v6, %v39_v5  ;;  %v2909_v13 = vpack.c.bf16 %v42_v10, %v41_v9  ;;  %v43_v14 = vld [vmem:[#allocation2 + $0x20] sm:$0xff]  ;;  %v44_v15 = vld [vmem:[#allocation2 + $0x28] sm:$0xff]  ;;  %v45_v21 = vld [vmem:[#allocation2 + $0x30] sm:$0x3]  ;;  %v3132_v41 = vand.u32 127, %v49_v0 }
  0x16   :  { %v2913_v18 = vpack.c.bf16 %v44_v15, %v43_v14  ;;  %v46_v28 = vld [vmem:[#allocation2 + $0xa0] sm:$0xff]  ;;  %v47_v29 = vld [vmem:[#allocation2 + $0xa8] sm:$0xff]  ;;  %v3058_v15 = vmov 0  }
  0x17   :  { %v51_v2 = vsub.s32 0, %v3115_v1  ;;  %v62_v3 = vsub.s32 1, %v3115_v1  ;;  %v73_v11 = vsub.s32 2, %v3115_v1  ;;  %2906 = vmatprep.subr.bf16.mxu0 %v2905_v12  ;;  %v84_v17 = vsub.s32 3, %v3115_v1  ;;  %v883_v32 = vld [vmem:[%s4005_s1] sm:$0xff]  ;;  %3003 = vset.pattern.permute.xlu0 %v3058_v15  ;;  %s3064_s1 = smov 32  }
  0x18   :  { %2908 = vmatpush3.bf16.msra.mxu0 %v2905_v12  ;;  %v95_v20 = vsub.s32 4, %v3115_v1  ;;  %v106_v23 = vsub.s32 5, %v3115_v1  ;;  %v117_v25 = vsub.s32 6, %v3115_v1  ;;  %v128_v27 = vsub.s32 7, %v3115_v1  ;;  %v885_v12 = vld [vmem:[#allocation2 + $0x40] sm:$0xff] }
  0x19   :  { %v52_v7 = vrot.slane %v38_v4, %v51_v2  ;;  %v63_v8 = vrot.slane %v38_v4, %v62_v3  ;;  %v74_v16 = vrot.slane %v38_v4, %v73_v11  ;;  %2910 = vmatprep.subr.bf16.mxu0 %v2909_v13  ;;  %v85_v19 = vrot.slane %v38_v4, %v84_v17  ;;  %v2039_v14 = vld [vmem:[%s4006_s2] sm:$0xff]  ;;  %s3066_s2 = smov [#allocation5]  }
  0x1a   :  { %v96_v22 = vrot.slane %v38_v4, %v95_v20  ;;  %v107_v24 = vrot.slane %v38_v4, %v106_v23  ;;  %v118_v26 = vrot.slane %v38_v4, %v117_v25  ;;  %v129_v30 = vrot.slane %v38_v4, %v128_v27  ;;  %s2454_s14 = sshll.u32 %s3066_s2, 4  ;;  %s2455_s14 = int_to_ptr.vmem [resolvable:$true] %s2454_s14 }
  0x1b   :  { %54 = vbcast.lane.b32.xlu0 %v52_v7, 256  ;;  %65 = vbcast.lane.b32.xlu1 %v63_v8, 256  ;;  %v2917_v31 = vpack.c.bf16 %v47_v29, %v46_v28  ;;  %v910_v33 = vrot.slane %v883_v32, %v51_v2  ;;  %v921_v34 = vrot.slane %v883_v32, %v62_v3  ;;  %v890_v28 = vld [vmem:[#allocation2 + $0x68] sm:$0xff]  ;;  %v891_v29 = vld [vmem:[#allocation2 + $0x70] sm:$0xff]  ;;  %s3028_s15 = scalar_lea.vmem %s2455_s14, 128  ;;  %p3033_p9 = scmp.lt.s32.totalorder %s2455_s14, %s2455_s14 }
  0x1c   :  { %2912 = vmatpush3.bf16.msra.mxu0 %v2909_v13  ;;  %v932_v35 = vrot.slane %v883_v32, %v73_v11  ;;  %v943_v36 = vrot.slane %v883_v32, %v84_v17  ;;  %v954_v37 = vrot.slane %v883_v32, %v95_v20  ;;  %v965_v38 = vrot.slane %v883_v32, %v106_v23  ;;  %v884_v11 = vld [vmem:[#allocation2 + $0x38] sm:$0xff]  ;;  %p3029_p8 = scmp.ne.s32.totalorder %s2455_s14, %s3028_s15  ;;  %p3034_p10 = scmp.lt.s32.totalorder %s3028_s15, %s3028_s15 }
  0x1d   :  { %2914 = vmatprep.subr.bf16.mxu0 %v2913_v18  ;;  %2918 = vmatprep.subr.bf16.mxu1 %v2917_v31  ;;  %v976_v39 = vrot.slane %v883_v32, %v117_v25  ;;  %v987_v40 = vrot.slane %v883_v32, %v128_v27  ;;  %v2921_v13 = vpack.c.bf16 %v885_v12, %v884_v11  ;;  %v3059_v17 = vmov 1   ;;  %v888_v23 = vld [vmem:[#allocation2 + $0x58] sm:$0xff] }
  0x1e   :  { %2920 = vmatpush3.bf16.msra.mxu1 %v2917_v31  ;;  %3004 = vset.pattern.permute.xlu1 %v3059_v17  ;;  %v2933_v32 = vpack.c.bf16 %v891_v29, %v890_v28  ;;  %v896_v28 = vld [vmem:[%s4009_s5 + $0x10] sm:$0xff]  ;;  %v899_v29 = vld [vmem:[%s4009_s5 + $0x28] sm:$0xff]  ;;  %p3035_p11 = por %p3034_p10, %p3033_p9 }
  0x1f   :  { %58 = vbcast.lane.b32.xlu0 %v52_v7, 264  ;;  %69 = vbcast.lane.b32.xlu1 %v63_v8, 264 }
  0x20   :  { %2916 = vmatpush3.bf16.msra.mxu0 %v2913_v18  ;;  %2922 = vmatprep.subr.bf16.mxu1 %v2921_v13  ;;  %v886_v18 = vld [vmem:[#allocation2 + $0x48] sm:$0xff]  ;;  %p3036_p12 = pnand %p3035_p11, %p3029_p8 }
  0x21   :  { %2715 = vmatprep.subr.msk.mxu0 %vm236_vm0, %v45_v21 }
  0x23   :  { %76 = vbcast.lane.b32.xlu0 %v74_v16, 256  ;;  %80 = vbcast.lane.b32.xlu1 %v74_v16, 264  ;;  %v2049_v16 = vadd.s32 10, %v2039_v14 }
  0x24   :  { %2716 = vmatpush3.msk.msra.mxu0 %vm236_vm0, %v45_v21 }
  0x27   :  { %87 = vbcast.lane.b32.xlu0 %v85_v19, 256  ;;  %91 = vbcast.lane.b32.xlu1 %v85_v19, 264  ;;  %v887_v19 = vld [vmem:[#allocation2 + $0x50] sm:$0xff] }
  0x2b   :  { %98 = vbcast.lane.b32.xlu0 %v96_v22, 256  ;;  %102 = vbcast.lane.b32.xlu1 %v96_v22, 264  ;;  %v2925_v22 = vpack.c.bf16 %v887_v19, %v886_v18  ;;  %v894_v18 = vld [vmem:[%s4009_s5] sm:$0xff] }
  0x2f   :  { %109 = vbcast.lane.b32.xlu0 %v107_v24, 256  ;;  %113 = vbcast.lane.b32.xlu1 %v107_v24, 264  ;;  %v889_v24 = vld [vmem:[#allocation2 + $0x60] sm:$0xff] }
  0x30   :  { %v2929_v27 = vpack.c.bf16 %v889_v24, %v888_v23  ;;  %v904_v23 = vld [vmem:[%s4009_s5 + $0x50] sm:$0xff] }
  0x31   :  { %v900_v24 = vld [vmem:[%s4009_s5 + $0x30] sm:$0xff] }
  0x33   :  { %120 = vbcast.lane.b32.xlu0 %v118_v26, 256  ;;  %124 = vbcast.lane.b32.xlu1 %v118_v26, 264 }
  0x37   :  { %131 = vbcast.lane.b32.xlu0 %v129_v30, 256  ;;  %135 = vbcast.lane.b32.xlu1 %v129_v30, 264 }
  0x3b   :  { %912 = vbcast.lane.b32.xlu0 %v910_v33, 256  ;;  %916 = vbcast.lane.b32.xlu1 %v910_v33, 264  ;;  %v892_v33 = vld [vmem:[#allocation2 + $0x78] sm:$0xff] }
  0x3f   :  { %923 = vbcast.lane.b32.xlu0 %v921_v34, 256  ;;  %927 = vbcast.lane.b32.xlu1 %v921_v34, 264  ;;  %v893_v34 = vld [vmem:[#allocation2 + $0x80] sm:$0xff] }
  0x43   :  { %934 = vbcast.lane.b32.xlu0 %v932_v35, 256  ;;  %938 = vbcast.lane.b32.xlu1 %v932_v35, 264 }
  0x47   :  { %945 = vbcast.lane.b32.xlu0 %v943_v36, 256  ;;  %949 = vbcast.lane.b32.xlu1 %v943_v36, 264 }
  0x4b   :  { %956 = vbcast.lane.b32.xlu0 %v954_v37, 256  ;;  %960 = vbcast.lane.b32.xlu1 %v954_v37, 264  ;;  %v2937_v37 = vpack.c.bf16 %v893_v34, %v892_v33  ;;  %v4011_v34 = vmov 0.0|0.0  }
  0x4f   :  { %967 = vbcast.lane.b32.xlu0 %v965_v38, 256  ;;  %971 = vbcast.lane.b32.xlu1 %v965_v38, 264 }
  0x53   :  { %978 = vbcast.lane.b32.xlu0 %v976_v39, 256  ;;  %982 = vbcast.lane.b32.xlu1 %v976_v39, 264 }
  0x57   :  { %989 = vbcast.lane.b32.xlu0 %v987_v40, 256  ;;  %993 = vbcast.lane.b32.xlu1 %v987_v40, 264 }
  0x5b   :  { %2044 = vperm.xlu0 %3003, %v2039_v14   ;;  %2051 = vperm.xlu1 %3004, %v2049_v16   ;;  %v895_v16 = vld [vmem:[%s4009_s5 + $0x8] sm:$0xff] }
  0x5f   :  { %3005 = vset.pattern.permute.xlu0 %v3059_v17  ;;  %v898_v17 = vld [vmem:[%s4009_s5 + $0x20] sm:$0xff] }
  0x60   :  { %v2941_v19 = vpack.c.bf16 %v898_v17, %v895_v16 }
  0x62   :  { %2942 = vmatprep.subr.bf16.mxu0 %v2941_v19 }
  0x8d   :  { %v55_v42 = vpop.permute.xlu0 %54  ;;  %v66_v43 = vpop.permute.xlu1 %65 }
  0x8e   :  { %vm139_vm2 = vcmp.eq.s32.totalorder %v55_v42, %v3132_v41  ;;  %vm141_vm3 = vcmp.eq.s32.totalorder %v66_v43, %v3132_v41 }
  0x8f   :  { %v2463_v45 = vsel %vm139_vm2, 1.0, %v3057_v44  ;;  %v2465_v48 = vsel %vm141_vm3, 1.0, %v3057_v44 }
  0x90   :  { %2717 = vmatprep.mubr.msk.f32.mxu0 %vm187_vm1, %v2463_v45 }
  0x91   :  { %v59_v46 = vpop.permute.xlu0 %58  ;;  %v70_v47 = vpop.permute.xlu1 %69 }
  0x92   :  { %vm140_vm4 = vcmp.eq.s32.totalorder %v59_v46, %v3132_v41  ;;  %vm142_vm5 = vcmp.eq.s32.totalorder %v70_v47, %v3132_v41 }
  0x93   :  { %v2464_v49 = vsel %vm140_vm4, 1.0, %v3057_v44  ;;  %v2466_v50 = vsel %vm142_vm5, 1.0, %v3057_v44  ;;  %vm1043_vm5 = vcmask 654336  }
  0x94   :  { %2718 = vmatmul.mubr.msk.f32.vlgmr.msra.gmra.mrb[0].mxu0 %vm187_vm1, %v2464_v49 }
  0x95   :  { %2720 = vmatprep.mubr.msk.f32.mxu0 %vm187_vm1, %v2465_v48  ;;  %v77_v51 = vpop.permute.xlu0 %76  ;;  %v81_v52 = vpop.permute.xlu1 %80 }
  0x96   :  { %vm143_vm6 = vcmp.eq.s32.totalorder %v77_v51, %v3132_v41  ;;  %vm144_vm7 = vcmp.eq.s32.totalorder %v81_v52, %v3132_v41 }
  0x97   :  { %v2467_v53 = vsel %vm143_vm6, 1.0, %v3057_v44  ;;  %v2468_v54 = vsel %vm144_vm7, 1.0, %v3057_v44 }
  0x98   :  { %2721 = vmatmul.mubr.msk.f32.gmra.mrb[2].mxu0 %vm187_vm1, %v2466_v50 }
  0x99   :  { %2723 = vmatprep.mubr.msk.f32.mxu0 %vm187_vm1, %v2467_v53  ;;  %v88_v55 = vpop.permute.xlu0 %87  ;;  %v92_v56 = vpop.permute.xlu1 %91 }
  0x9a   :  { %vm145_vm8 = vcmp.eq.s32.totalorder %v88_v55, %v3132_v41  ;;  %vm146_vm9 = vcmp.eq.s32.totalorder %v92_v56, %v3132_v41 }
  0x9b   :  { %v2469_v57 = vsel %vm145_vm8, 1.0, %v3057_v44  ;;  %v2470_v58 = vsel %vm146_vm9, 1.0, %v3057_v44 }
  0x9c   :  { %2724 = vmatmul.mubr.msk.f32.gmra.mrb[4].mxu0 %vm187_vm1, %v2468_v54 }
  0x9d   :  { %2726 = vmatprep.mubr.msk.f32.mxu0 %vm187_vm1, %v2469_v57  ;;  %v99_v59 = vpop.permute.xlu0 %98  ;;  %v103_v60 = vpop.permute.xlu1 %102 }
  0x9e   :  { %vm147_vm10 = vcmp.eq.s32.totalorder %v99_v59, %v3132_v41  ;;  %vm148_vm11 = vcmp.eq.s32.totalorder %v103_v60, %v3132_v41 }
  0x9f   :  { %v2471_v61 = vsel %vm147_vm10, 1.0, %v3057_v44  ;;  %v2472_v62 = vsel %vm148_vm11, 1.0, %v3057_v44 }
  0xa0   :  { %2727 = vmatmul.mubr.msk.f32.gmra.mrb[6].mxu0 %vm187_vm1, %v2470_v58 }
  0xa1   :  { %2729 = vmatprep.mubr.msk.f32.mxu0 %vm187_vm1, %v2471_v61  ;;  %v110_v63 = vpop.permute.xlu0 %109  ;;  %v114_v0 = vpop.permute.xlu1 %113 }
  0xa2   :  { %vm149_vm12 = vcmp.eq.s32.totalorder %v110_v63, %v3132_v41  ;;  %vm150_vm13 = vcmp.eq.s32.totalorder %v114_v0, %v3132_v41 }
  0xa3   :  { %v2473_v1 = vsel %vm149_vm12, 1.0, %v3057_v44  ;;  %v2474_v2 = vsel %vm150_vm13, 1.0, %v3057_v44 }
  0xa4   :  { %2730 = vmatmul.mubr.msk.f32.gmra.mrb[8].mxu0 %vm187_vm1, %v2472_v62 }
  0xa5   :  { %2732 = vmatprep.mubr.msk.f32.mxu0 %vm187_vm1, %v2473_v1  ;;  %v121_v3 = vpop.permute.xlu0 %120  ;;  %v125_v4 = vpop.permute.xlu1 %124 }
  0xa6   :  { %vm151_vm14 = vcmp.eq.s32.totalorder %v121_v3, %v3132_v41  ;;  %vm152_vm15 = vcmp.eq.s32.totalorder %v125_v4, %v3132_v41 }
  0xa7   :  { %v2475_v5 = vsel %vm151_vm14, 1.0, %v3057_v44  ;;  %v2476_v6 = vsel %vm152_vm15, 1.0, %v3057_v44 }
  0xa8   :  { %2733 = vmatmul.mubr.msk.f32.gmra.mrb[10].mxu0 %vm187_vm1, %v2474_v2 }
  0xa9   :  { %2735 = vmatprep.mubr.msk.f32.mxu0 %vm187_vm1, %v2475_v5  ;;  %v132_v7 = vpop.permute.xlu0 %131  ;;  %v136_v8 = vpop.permute.xlu1 %135 }
  0xaa   :  { %vm153_vm0 = vcmp.eq.s32.totalorder %v132_v7, %v3132_v41  ;;  %vm154_vm2 = vcmp.eq.s32.totalorder %v136_v8, %v3132_v41 }
  0xab   :  { %v2477_v9 = vsel %vm153_vm0, 1.0, %v3057_v44  ;;  %v2478_v10 = vsel %vm154_vm2, 1.0, %v3057_v44 }
  0xac   :  { %2736 = vmatmul.mubr.msk.f32.gmra.mrb[12].mxu0 %vm187_vm1, %v2476_v6 }
  0xad   :  { %2738 = vmatprep.mubr.msk.f32.mxu0 %vm187_vm1, %v2477_v9  ;;  %v913_v43 = vpop.permute.xlu0 %912  ;;  %v917_v46 = vpop.permute.xlu1 %916 }
  0xae   :  { %vm995_vm3 = vcmp.eq.s32.totalorder %v913_v43, %v3132_v41  ;;  %vm996_vm4 = vcmp.eq.s32.totalorder %v917_v46, %v3132_v41 }
  0xaf   :  { %v2513_v51 = vsel %vm995_vm3, 1.0, %v3057_v44  ;;  %v2514_v54 = vsel %vm996_vm4, 1.0, %v3057_v44  ;;  %vm595_vm4 = vcmask 1046528  }
  0xb0   :  { %2739 = vmatmul.mubr.msk.f32.gmra.mrb[14].mxu0 %vm187_vm1, %v2478_v10  ;;  %vm385_vm1 = vcmask 130048  }
  0xb1   :  { %1349 = vmatprep.mubr.f32.mxu0 %v3057_v44  ;;  %v924_v48 = vpop.permute.xlu0 %923  ;;  %v928_v52 = vpop.permute.xlu1 %927 }
  0xb2   :  { %vm997_vm6 = vcmp.eq.s32.totalorder %v924_v48, %v3132_v41  ;;  %vm998_vm7 = vcmp.eq.s32.totalorder %v928_v52, %v3132_v41 }
  0xb3   :  { %v2515_v55 = vsel %vm997_vm6, 1.0, %v3057_v44  ;;  %v2516_v58 = vsel %vm998_vm7, 1.0, %v3057_v44  ;;  %vm809_vm6 = vcmask 261120  }
  0xb5   :  { %v935_v53 = vpop.permute.xlu0 %934  ;;  %v939_v56 = vpop.permute.xlu1 %938 }
  0xb6   :  { %vm999_vm8 = vcmp.eq.s32.totalorder %v935_v53, %v3132_v41  ;;  %vm1000_vm9 = vcmp.eq.s32.totalorder %v939_v56, %v3132_v41 }
  0xb7   :  { %v2517_v59 = vsel %vm999_vm8, 1.0, %v3057_v44  ;;  %v2518_v62 = vsel %vm1000_vm9, 1.0, %v3057_v44  ;;  %vm3062_vm9 = vmmov 0  }
  0xb9   :  { %v946_v57 = vpop.permute.xlu0 %945  ;;  %v950_v60 = vpop.permute.xlu1 %949 }
  0xba   :  { %vm1001_vm10 = vcmp.eq.s32.totalorder %v946_v57, %v3132_v41  ;;  %vm1002_vm11 = vcmp.eq.s32.totalorder %v950_v60, %v3132_v41 }
  0xbb   :  { %v2519_v63 = vsel %vm1001_vm10, 1.0, %v3057_v44  ;;  %v2520_v2 = vsel %vm1002_vm11, 1.0, %v3057_v44  ;;  %vm2057_vm10 = vcmask 179200   ;;  %vm2141_vm11 = vcmask 48128  }
  0xbd   :  { %v957_v61 = vpop.permute.xlu0 %956  ;;  %v961_v0 = vpop.permute.xlu1 %960 }
  0xbe   :  { %vm1003_vm12 = vcmp.eq.s32.totalorder %v957_v61, %v3132_v41  ;;  %vm1004_vm13 = vcmp.eq.s32.totalorder %v961_v0, %v3132_v41 }
  0xbf   :  { %v2521_v3 = vsel %vm1003_vm12, 1.0, %v3057_v44  ;;  %v2522_v6 = vsel %vm1004_vm13, 1.0, %v3057_v44  ;;  %vm1872_vm12 = vcmask 1043456   ;;  %vm1767_vm13 = vcmask 1044480  }
  0xc1   :  { %v968_v1 = vpop.permute.xlu0 %967  ;;  %v972_v4 = vpop.permute.xlu1 %971 }
  0xc2   :  { %vm1005_vm14 = vcmp.eq.s32.totalorder %v968_v1, %v3132_v41  ;;  %vm1006_vm15 = vcmp.eq.s32.totalorder %v972_v4, %v3132_v41 }
  0xc3   :  { %v2523_v7 = vsel %vm1005_vm14, 1.0, %v3057_v44  ;;  %v2524_v10 = vsel %vm1006_vm15, 1.0, %v3057_v44  ;;  %vm1967_vm14 = vcmask 519168   ;;  %vm1965_vm15 = vcmask 523264  }
  0xc5   :  { %v979_v5 = vpop.permute.xlu0 %978  ;;  %v983_v8 = vpop.permute.xlu1 %982 }
  0xc6   :  { %vm1007_vm0 = vcmp.eq.s32.totalorder %v979_v5, %v3132_v41  ;;  %vm1008_vm2 = vcmp.eq.s32.totalorder %v983_v8, %v3132_v41 }
  0xc7   :  { %v2525_v11 = vsel %vm1007_vm0, 1.0, %v3057_v44  ;;  %vm2227_vm0 = vcmask 1041409  }
  0xc9   :  { %v990_v9 = vpop.permute.xlu0 %989  ;;  %v994_v12 = vpop.permute.xlu1 %993 }
  0xca   :  { %vm1010_vm3 = vcmp.eq.s32.totalorder %v994_v12, %v3132_v41 }
  0xcb   :  { %v2528_v15 = vsel %vm1010_vm3, 1.0, %v3057_v44  ;;  %vm2233_vm3 = vcmask 1044484  }
 0x167   :  { %v2719_v20 = vpop.f32.mrb[0].mxu0 }
 0x168   :  { %v306_v21 = vpop.f32.mrb[1].mxu0 }
 0x169   :  { %2745 = vmatprep.mubr.msk.f32.mxu1 %vm385_vm1, %v306_v21 }
 0x16a   :  { %2746 = vmatmul.mubr.msk.f32.vlgmr.msra.gmra.mrb[0].mxu1 %vm385_vm1, %v2719_v20  ;;  %v897_v20 = vld [vmem:[%s4009_s5 + $0x18] sm:$0xff] }
 0x16b   :  { %2924 = vmatpush3.bf16.msra.mxu1 %v2921_v13  ;;  %v2722_v25 = vpop.f32.mrb[2].mxu0  ;;  %v2526_v13 = vsel %vm1008_vm2, 1.0, %v3057_v44  ;;  %v2943_v21 = vpack.c.bf16 %v897_v20, %v894_v18  ;;  %vm2229_vm2 = vcmask 1042434  }
 0x16c   :  { %v316_v26 = vpop.f32.mrb[3].mxu0  ;;  %2926 = vmatprep.subr.bf16.mxu1 %v2925_v22 }
 0x16d   :  { %2748 = vmatprep.mubr.msk.f32.mxu1 %vm385_vm1, %v316_v26  ;;  %2944 = vmatpush1.bf16.msra.mxu0 %v2943_v21  ;;  %v903_v26 = vld [vmem:[%s4009_s5 + $0x48] sm:$0xff] }
 0x16e   :  { %2749 = vmatmul.mubr.msk.f32.gmra.mrb[2].mxu1 %vm385_vm1, %v2722_v25 }
 0x16f   :  { %v2725_v30 = vpop.f32.mrb[4].mxu0  ;;  %2928 = vmatpush3.bf16.msra.mxu1 %v2925_v22  ;;  %v901_v22 = vld [vmem:[%s4009_s5 + $0x38] sm:$0xff] }
 0x170   :  { %v326_v31 = vpop.f32.mrb[5].mxu0  ;;  %2930 = vmatprep.subr.bf16.mxu1 %v2929_v27  ;;  %v2945_v25 = vpack.c.bf16 %v904_v23, %v901_v22 }
 0x171   :  { %2751 = vmatprep.mubr.msk.f32.mxu1 %vm385_vm1, %v326_v31  ;;  %v902_v31 = vld [vmem:[%s4009_s5 + $0x40] sm:$0xff] }
 0x172   :  { %2752 = vmatmul.mubr.msk.f32.gmra.mrb[4].mxu1 %vm385_vm1, %v2725_v30  ;;  %2946 = vmatprep.subr.bf16.mxu0 %v2945_v25  ;;  %v2949_v30 = vpack.c.bf16 %v899_v29, %v896_v28 }
 0x173   :  { %v2728_v35 = vpop.f32.mrb[6].mxu0  ;;  %2932 = vmatpush3.bf16.msra.mxu1 %v2929_v27  ;;  %v2947_v27 = vpack.c.bf16 %v903_v26, %v900_v24 }
 0x174   :  { %v336_v36 = vpop.f32.mrb[7].mxu0  ;;  %2934 = vmatprep.subr.bf16.mxu1 %v2933_v32 }
 0x175   :  { %2754 = vmatprep.mubr.msk.f32.mxu1 %vm385_vm1, %v336_v36  ;;  %2948 = vmatpush1.bf16.msra.mxu0 %v2947_v27 }
 0x176   :  { %2755 = vmatmul.mubr.msk.f32.gmra.mrb[6].mxu1 %vm385_vm1, %v2728_v35  ;;  %2960 = vmatprep.subr.bf16.mxu0 %v4011_v34 }
 0x177   :  { %v2731_v38 = vpop.f32.mrb[8].mxu0  ;;  %2936 = vmatpush3.bf16.msra.mxu1 %v2933_v32  ;;  %v905_v32 = vld [vmem:[%s4009_s5 + $0x58] sm:$0xff]  ;;  %s3061_s5 = smov 96  }
 0x178   :  { %v346_v39 = vpop.f32.mrb[9].mxu0  ;;  %2938 = vmatprep.subr.bf16.mxu1 %v2937_v37  ;;  %v2953_v33 = vpack.c.bf16 %v905_v32, %v902_v31 }
 0x179   :  { %2757 = vmatprep.mubr.msk.f32.mxu1 %vm385_vm1, %v346_v39 }
 0x17a   :  { %2758 = vmatmul.mubr.msk.f32.gmra.mrb[8].mxu1 %vm385_vm1, %v2731_v38 }
 0x17b   :  { %v2734_v40 = vpop.f32.mrb[10].mxu0  ;;  %2940 = vmatpush3.bf16.msra.mxu1 %v2937_v37 }
 0x17c   :  { %v356_v42 = vpop.f32.mrb[11].mxu0  ;;  %2950 = vmatprep.subr.bf16.mxu1 %v2949_v30 }
 0x17d   :  { %2760 = vmatprep.mubr.msk.f32.mxu1 %vm385_vm1, %v356_v42 }
 0x17e   :  { %2761 = vmatmul.mubr.msk.f32.gmra.mrb[10].mxu1 %vm385_vm1, %v2734_v40 }
 0x17f   :  { %v2737_v45 = vpop.f32.mrb[12].mxu0 }
 0x180   :  { %v366_v47 = vpop.f32.mrb[13].mxu0 }
 0x181   :  { %2763 = vmatprep.mubr.msk.f32.mxu1 %vm385_vm1, %v366_v47 }
 0x182   :  { %2764 = vmatmul.mubr.msk.f32.gmra.mrb[12].mxu1 %vm385_vm1, %v2737_v45 }
 0x183   :  { %v2740_v49 = vpop.f32.mrb[14].mxu0 }
 0x184   :  { %v376_v50 = vpop.f32.mrb[15].mxu0 }
 0x185   :  { %2766 = vmatprep.mubr.msk.f32.mxu1 %vm385_vm1, %v376_v50 }
 0x186   :  { %2767 = vmatmul.mubr.msk.f32.gmra.mrb[14].mxu1 %vm385_vm1, %v2740_v49  ;;  %vm1009_vm1 = vcmp.eq.s32.totalorder %v990_v9, %v3132_v41 }
 0x187   :  { %2789 = vmatprep.mubr.msk.f32.mxu1 %vm1043_vm5, %v2513_v51  ;;  %v2527_v14 = vsel %vm1009_vm1, 1.0, %v3057_v44  ;;  %vm2231_vm1 = vcmask 1043459  }
 0x18a   :  { %2790 = vmatmul.mubr.msk.f32.vlgmr.msra.gmra.mrb[16].mxu1 %vm1043_vm5, %v2514_v54 }
 0x18b   :  { %2792 = vmatprep.mubr.msk.f32.mxu1 %vm1043_vm5, %v2515_v55  ;;  %2952 = vmatpush3.bf16.msra.mxu1 %v2949_v30 }
 0x18c   :  { %2954 = vmatprep.subr.bf16.mxu1 %v2953_v33 }
 0x18e   :  { %2793 = vmatmul.mubr.msk.f32.gmra.mrb[18].mxu1 %vm1043_vm5, %v2516_v58 }
 0x18f   :  { %2795 = vmatprep.mubr.msk.f32.mxu1 %vm1043_vm5, %v2517_v59  ;;  %2956 = vmatpush3.bf16.msra.mxu1 %v2953_v33  ;;  %v2040_v33 = vld [vmem:[#allocation2 + $0x88] sm:$0xff] }
 0x190   :  { %2957 = vmatprep.subr.bf16.mxu1 %v4011_v34 }
 0x192   :  { %2796 = vmatmul.mubr.msk.f32.gmra.mrb[20].mxu1 %vm1043_vm5, %v2518_v62 }
 0x193   :  { %2798 = vmatprep.mubr.msk.f32.mxu1 %vm1043_vm5, %v2519_v63 }
 0x196   :  { %2799 = vmatmul.mubr.msk.f32.gmra.mrb[22].mxu1 %vm1043_vm5, %v2520_v2 }
 0x197   :  { %2801 = vmatprep.mubr.msk.f32.mxu1 %vm1043_vm5, %v2521_v3 }
 0x19a   :  { %2802 = vmatmul.mubr.msk.f32.gmra.mrb[24].mxu1 %vm1043_vm5, %v2522_v6 }
 0x19b   :  { %2804 = vmatprep.mubr.msk.f32.mxu1 %vm1043_vm5, %v2523_v7 }
 0x19e   :  { %2805 = vmatmul.mubr.msk.f32.gmra.mrb[26].mxu1 %vm1043_vm5, %v2524_v10 }
 0x19f   :  { %2807 = vmatprep.mubr.msk.f32.mxu1 %vm1043_vm5, %v2525_v11 }
 0x1a2   :  { %2808 = vmatmul.mubr.msk.f32.gmra.mrb[28].mxu1 %vm1043_vm5, %v2526_v13 }
 0x1a3   :  { %2810 = vmatprep.mubr.msk.f32.mxu1 %vm1043_vm5, %v2527_v14 }
 0x1a6   :  { %2811 = vmatmul.mubr.msk.f32.gmra.mrb[30].mxu1 %vm1043_vm5, %v2528_v15  ;;  %vm684_vm5 = vcmask 1045504  }
 0x23d   :  { %v3288_v35 = vpop.f32.mrb[0].mxu1 }
 0x23e   :  { %v597_v36 = vrot.slane %v3288_v35, 1  ;;  %v4028_v37 = vrot.slane %v3288_v35, 2  ;;  %v3292_v38 = vpop.f32.mrb[1].mxu1 }
 0x23f   :  { %4061 = vst [vmem:[#allocation8_spill] sm:$0xff] %v3292_v38  ;;  %v596_v39 = vrot.slane %v3292_v38, 1  ;;  %v685_v40 = vrot.slane %v3292_v38, 2 }
 0x240   :  { %622 = vrot.lane.b32.xlu0 %v597_v36, %s3061_s5 }
 0x241   :  { %v3297_v42 = vpop.f32.mrb[2].mxu1  ;;  %v598_v43 = vsel %vm595_vm4, %v596_v39, %v597_v36  ;;  %v3303_v45 = vsel %vm684_vm5, %v685_v40, %v4028_v37  ;;  %v2041_v36 = vld [vmem:[#allocation2 + $0x90] sm:$0xff] }
 0x242   :  { %v4033_v46 = vrot.slane %v3297_v42, 1  ;;  %v4027_v47 = vrot.slane %v3297_v42, 2  ;;  %620 = vrot.lane.b32.xlu1 %v598_v43, %s3061_s5  ;;  %v3308_v48 = vpop.f32.mrb[3].mxu1 }
 0x243   :  { %4062 = vst [vmem:[#allocation9_spill] sm:$0xff] %v3308_v48  ;;  %v599_v49 = vrot.slane %v3308_v48, 1  ;;  %v688_v50 = vrot.slane %v3308_v48, 2 }
 0x245   :  { %v3312_v51 = vpop.f32.mrb[4].mxu1  ;;  %v3317_v52 = vsel %vm595_vm4, %v599_v49, %v4033_v46  ;;  %v3322_v53 = vsel %vm684_vm5, %v688_v50, %v4027_v47  ;;  %v2958_v49 = vpack.c.bf16 %v2041_v36, %v2040_v33 }
 0x246   :  { %v4031_v54 = vrot.slane %v3312_v51, 1  ;;  %v4024_v55 = vrot.slane %v3312_v51, 2  ;;  %v3326_v56 = vpop.f32.mrb[5].mxu1 }
 0x247   :  { %4063 = vst [vmem:[#allocation10_spill] sm:$0xff] %v3326_v56  ;;  %v602_v57 = vrot.slane %v3326_v56, 1  ;;  %v691_v58 = vrot.slane %v3326_v56, 2 }
 0x249   :  { %v3330_v59 = vpop.f32.mrb[6].mxu1  ;;  %v3335_v60 = vsel %vm595_vm4, %v602_v57, %v4031_v54  ;;  %v3340_v61 = vsel %vm684_vm5, %v691_v58, %v4024_v55 }
 0x24a   :  { %v4030_v62 = vrot.slane %v3330_v59, 1  ;;  %v4022_v63 = vrot.slane %v3330_v59, 2  ;;  %v3344_v0 = vpop.f32.mrb[7].mxu1 }
 0x24b   :  { %4064 = vst [vmem:[#allocation11_spill] sm:$0xff] %v3344_v0  ;;  %v605_v1 = vrot.slane %v3344_v0, 1  ;;  %v694_v2 = vrot.slane %v3344_v0, 2 }
 0x24d   :  { %v3348_v3 = vpop.f32.mrb[8].mxu1  ;;  %v3353_v4 = vsel %vm595_vm4, %v605_v1, %v4030_v62  ;;  %v3358_v5 = vsel %vm684_vm5, %v694_v2, %v4022_v63 }
 0x24e   :  { %v4025_v6 = vrot.slane %v3348_v3, 1  ;;  %v4019_v7 = vrot.slane %v3348_v3, 2  ;;  %v3362_v8 = vpop.f32.mrb[9].mxu1 }
 0x24f   :  { %4065 = vst [vmem:[#allocation12_spill] sm:$0xff] %v3362_v8  ;;  %v608_v9 = vrot.slane %v3362_v8, 1  ;;  %v697_v10 = vrot.slane %v3362_v8, 2 }
 0x251   :  { %v3366_v11 = vpop.f32.mrb[10].mxu1  ;;  %v3371_v12 = vsel %vm595_vm4, %v608_v9, %v4025_v6  ;;  %v3376_v13 = vsel %vm684_vm5, %v697_v10, %v4019_v7  ;;  %v2042_v9 = vld [vmem:[#allocation2 + $0x98] sm:$0x3f] }
 0x252   :  { %v4023_v14 = vrot.slane %v3366_v11, 1  ;;  %v4016_v15 = vrot.slane %v3366_v11, 2  ;;  %v3380_v16 = vpop.f32.mrb[11].mxu1 }
 0x253   :  { %4066 = vst [vmem:[#allocation13_spill] sm:$0xff] %v3380_v16  ;;  %v611_v17 = vrot.slane %v3380_v16, 1  ;;  %v700_v18 = vrot.slane %v3380_v16, 2 }
 0x255   :  { %v3384_v19 = vpop.f32.mrb[12].mxu1  ;;  %v3389_v20 = vsel %vm595_vm4, %v611_v17, %v4023_v14  ;;  %v3394_v21 = vsel %vm684_vm5, %v700_v18, %v4016_v15 }
 0x256   :  { %v4020_v22 = vrot.slane %v3384_v19, 1  ;;  %v4014_v23 = vrot.slane %v3384_v19, 2  ;;  %v3398_v24 = vpop.f32.mrb[13].mxu1 }
 0x257   :  { %4067 = vst [vmem:[#allocation14_spill] sm:$0xff] %v3398_v24  ;;  %v614_v25 = vrot.slane %v3398_v24, 1  ;;  %v703_v26 = vrot.slane %v3398_v24, 2 }
 0x259   :  { %v3402_v27 = vpop.f32.mrb[14].mxu1  ;;  %v3407_v28 = vsel %vm595_vm4, %v614_v25, %v4020_v22  ;;  %v3412_v29 = vsel %vm684_vm5, %v703_v26, %v4014_v23 }
 0x25a   :  { %v4018_v30 = vrot.slane %v3402_v27, 1  ;;  %v4013_v31 = vrot.slane %v3402_v27, 2  ;;  %v3416_v32 = vpop.f32.mrb[15].mxu1 }
 0x25b   :  { %4068 = vst [vmem:[#allocation15_spill] sm:$0xff] %v3416_v32  ;;  %v617_v39 = vrot.slane %v3416_v32, 1  ;;  %v706_v40 = vrot.slane %v3416_v32, 2 }
 0x25d   :  { %v2791_v43 = vpop.f32.mrb[16].mxu1  ;;  %v3423_v50 = vsel %vm595_vm4, %v617_v39, %v4018_v30  ;;  %v3428_v57 = vsel %vm684_vm5, %v706_v40, %v4013_v31  ;;  %v2045_v40 = vpop.permute.xlu0 %2044 }
 0x25e   :  { %v1158_v58 = vpop.f32.mrb[17].mxu1  ;;  %vm2046_vm7 = vcmp.eq.s32.totalorder %v2045_v40, %v3132_v41 }
 0x25f   :  { %2545 = vmatmul.mubr.msk.f32.vlgmr.msra.gmra.mrb[16].mxu0 %vm809_vm6, %v1158_v58  ;;  %2821 = vmatprep.mubr.msk.f32.mxu1 %vm809_vm6, %v1158_v58 }
 0x260   :  { %2822 = vmatmul.mubr.msk.f32.vlgmr.msra.gmra.mrb[32].mxu1 %vm809_vm6, %v2791_v43  ;;  %1355 = vmatprep.mubr.f32.mxu0 %v3057_v44 }
 0x261   :  { %v2794_v1 = vpop.f32.mrb[18].mxu1  ;;  %2959 = vmatpush3.bf16.msra.mxu1 %v2958_v49  ;;  %v2052_v49 = vpop.permute.xlu1 %2051 }
 0x262   :  { %v1168_v2 = vpop.f32.mrb[19].mxu1  ;;  %2849 = vmatprep.subr.mxu1 %v3057_v44  ;;  %vm2053_vm8 = vcmp.eq.s32.totalorder %v2052_v49, %v3132_v41 }
 0x263   :  { %2546 = vmatmul.mubr.msk.f32.gmra.mrb[18].mxu0 %vm809_vm6, %v2791_v43  ;;  %2824 = vmatprep.mubr.msk.f32.mxu1 %vm809_vm6, %v1168_v2 }
 0x264   :  { %2825 = vmatmul.mubr.msk.f32.gmra.mrb[34].mxu1 %vm809_vm6, %v2794_v1  ;;  %1361 = vmatprep.mubr.f32.mxu0 %v3057_v44 }
 0x265   :  { %v2797_v10 = vpop.f32.mrb[20].mxu1  ;;  %2850 = vmatpush3.msk.msra.mxu1 %vm684_vm5, %v2042_v9  ;;  %v2579_v9 = vsel %vm2053_vm8, 1.0, %v3057_v44  ;;  %vm2239_vm8 = vcmask 1047559  }
 0x266   :  { %v1178_v17 = vpop.f32.mrb[21].mxu1  ;;  %2854 = vmatprep.subr.mxu1 %v3057_v44 }
 0x267   :  { %2547 = vmatmul.mubr.msk.f32.gmra.mrb[20].mxu0 %vm809_vm6, %v1168_v2  ;;  %2827 = vmatprep.mubr.msk.f32.mxu1 %vm809_vm6, %v1178_v17  ;;  %v2578_v2 = vsel %vm2046_vm7, 1.0, %v3057_v44  ;;  %vm811_vm7 = vcmask 259072  }
 0x268   :  { %1367 = vmatprep.mubr.f32.mxu0 %v3057_v44  ;;  %2828 = vmatmul.mubr.msk.f32.gmra.mrb[36].mxu1 %vm809_vm6, %v2797_v10  ;;  %v2056_v41 = vadd.f32 %v2579_v9, %v2578_v2 }
 0x269   :  { %v2800_v18 = vpop.f32.mrb[22].mxu1 }
 0x26a   :  { %v1188_v25 = vpop.f32.mrb[23].mxu1 }
 0x26b   :  { %2548 = vmatmul.mubr.msk.f32.gmra.mrb[22].mxu0 %vm809_vm6, %v2794_v1  ;;  %2830 = vmatprep.mubr.msk.f32.mxu1 %vm809_vm6, %v1188_v25 }
 0x26c   :  { %1373 = vmatprep.mubr.f32.mxu0 %v3057_v44  ;;  %2831 = vmatmul.mubr.msk.f32.gmra.mrb[38].mxu1 %vm809_vm6, %v2800_v18 }
 0x26d   :  { %v2803_v26 = vpop.f32.mrb[24].mxu1 }
 0x26e   :  { %v1198_v33 = vpop.f32.mrb[25].mxu1 }
 0x26f   :  { %2549 = vmatmul.mubr.msk.f32.gmra.mrb[24].mxu0 %vm809_vm6, %v1178_v17  ;;  %2833 = vmatprep.mubr.msk.f32.mxu1 %vm809_vm6, %v1198_v33  ;;  %v2135_v17 = vld [vmem:[#allocation2 + $0xc0] sm:$0x3f] }
 0x270   :  { %1379 = vmatprep.mubr.f32.mxu0 %v3057_v44  ;;  %2834 = vmatmul.mubr.msk.f32.gmra.mrb[40].mxu1 %vm809_vm6, %v2803_v26 }
 0x271   :  { %v2806_v36 = vpop.f32.mrb[26].mxu1 }
 0x272   :  { %v1208_v39 = vpop.f32.mrb[27].mxu1 }
 0x273   :  { %2550 = vmatmul.mubr.msk.f32.gmra.mrb[26].mxu0 %vm809_vm6, %v2797_v10  ;;  %2836 = vmatprep.mubr.msk.f32.mxu1 %vm809_vm6, %v1208_v39 }
 0x274   :  { %1385 = vmatprep.mubr.f32.mxu0 %v3057_v44  ;;  %2837 = vmatmul.mubr.msk.f32.gmra.mrb[42].mxu1 %vm809_vm6, %v2806_v36 }
 0x275   :  { %v2809_v43 = vpop.f32.mrb[28].mxu1 }
 0x276   :  { %v1218_v58 = vpop.f32.mrb[29].mxu1 }
 0x277   :  { %2551 = vmatmul.mubr.msk.f32.gmra.mrb[28].mxu0 %vm809_vm6, %v1188_v25  ;;  %2839 = vmatprep.mubr.msk.f32.mxu1 %vm809_vm6, %v1218_v58 }
 0x278   :  { %1391 = vmatprep.mubr.f32.mxu0 %v3057_v44  ;;  %2840 = vmatmul.mubr.msk.f32.gmra.mrb[44].mxu1 %vm809_vm6, %v2809_v43 }
 0x279   :  { %v2812_v1 = vpop.f32.mrb[30].mxu1 }
 0x27a   :  { %v1228_v10 = vpop.f32.mrb[31].mxu1 }
 0x27b   :  { %2552 = vmatmul.mubr.msk.f32.gmra.mrb[30].mxu0 %vm809_vm6, %v2800_v18  ;;  %2842 = vmatprep.mubr.msk.f32.mxu1 %vm809_vm6, %v1228_v10  ;;  %v2134_v18 = vld [vmem:[%s4007_s3] sm:$0xff]  ;;  %s3063_s3 = smov 64  }
 0x27c   :  { %1397 = vmatprep.mubr.f32.mxu0 %v3057_v44  ;;  %2843 = vmatmul.mubr.msk.f32.gmra.mrb[46].mxu1 %vm809_vm6, %v2812_v1 }
 0x27d   :  { %2851 = vmatprep.mubr.msk.f32.mxu1 %vm3062_vm9, %v3057_v44 }
 0x27f   :  { %2553 = vmatmul.mubr.msk.f32.gmra.mrb[32].mxu0 %vm809_vm6, %v1198_v33 }
 0x280   :  { %1403 = vmatprep.mubr.f32.mxu0 %v3057_v44  ;;  %2852 = vmatmul.mubr.msk.f32.vlgmr.msra.gmra.mrb[48].mxu1 %vm2057_vm10, %v2056_v41  ;;  %vm2271_vm10 = vcmask 916480  }
 0x281   :  { %2855 = vmatpush3.msk.msra.mxu1 %vm684_vm5, %v2135_v17  ;;  %2856 = vmatprep.mubr.msk.f32.mxu1 %vm3062_vm9, %v3057_v44 }
 0x282   :  { %2984 = vmatprep.subr.bf16.mxu1 %v4011_v34 }
 0x283   :  { %2554 = vmatmul.mubr.msk.f32.gmra.mrb[34].mxu0 %vm809_vm6, %v2803_v26 }
 0x284   :  { %1409 = vmatprep.mubr.f32.mxu0 %v3057_v44  ;;  %2857 = vmatmul.mubr.msk.f32.vlgmr.msra.gmra.mrb[50].mxu1 %vm2141_vm11, %v2134_v18 }
 0x285   :  { %2902 = vmatprep.mubr.msk.f32.mxu1 %vm3062_vm9, %v3057_v44 }
 0x287   :  { %2555 = vmatmul.mubr.msk.f32.gmra.mrb[36].mxu0 %vm809_vm6, %v1208_v39 }
 0x288   :  { %1415 = vmatprep.mubr.f32.mxu0 %v3057_v44 }
 0x28b   :  { %2556 = vmatmul.mubr.msk.f32.gmra.mrb[38].mxu0 %vm809_vm6, %v2806_v36 }
 0x28c   :  { %1421 = vmatprep.mubr.f32.mxu0 %v3057_v44 }
 0x28f   :  { %2557 = vmatmul.mubr.msk.f32.gmra.mrb[40].mxu0 %vm809_vm6, %v1218_v58 }
 0x290   :  { %1427 = vmatprep.mubr.f32.mxu0 %v3057_v44 }
 0x293   :  { %2558 = vmatmul.mubr.msk.f32.gmra.mrb[42].mxu0 %vm809_vm6, %v2809_v43 }
 0x294   :  { %1433 = vmatprep.mubr.f32.mxu0 %v3057_v44 }
 0x297   :  { %2559 = vmatmul.mubr.msk.f32.gmra.mrb[44].mxu0 %vm809_vm6, %v1228_v10 }
 0x298   :  { %1439 = vmatprep.mubr.f32.mxu0 %v3057_v44 }
 0x29b   :  { %2560 = vmatmul.mubr.msk.f32.gmra.mrb[46].mxu0 %vm809_vm6, %v2812_v1 }
 0x29c   :  { %2891 = vmatprep.mubr.msk.f32.mxu0 %vm3062_vm9, %v3057_v44  ;;  %vm2269_vm9 = vcmask 785408  }
 0x332   :  { %v3497_v25 = vpop.f32.mrb[16].mxu0 }
 0x333   :  { %v1353_v26 = vpop.f32.mrb[17].mxu0  ;;  %v3499_v33 = vpop.f32.mrb[32].mxu1  ;;  %v1607_v49 = vrot.slane %v3497_v25, 1 }
 0x334   :  { %v4015_v36 = vrot.slane %v3499_v33, 4  ;;  %v1512_v39 = vpop.f32.mrb[33].mxu1  ;;  %v1711_v58 = vrot.slane %v1353_v26, 2  ;;  %v1768_v10 = vrot.slane %v1353_v26, 3 }
 0x335   :  { %v1873_v40 = vrot.slane %v1512_v39, 4 }
 0x336   :  { %v3502_v43 = vpop.f32.mrb[18].mxu0 }
 0x337   :  { %v1608_v1 = vrot.slane %v3502_v43, 1  ;;  %v3506_v2 = vpop.f32.mrb[19].mxu0  ;;  %v3508_v44 = vpop.f32.mrb[34].mxu1  ;;  %v3513_v9 = vsel %vm1872_vm12, %v1873_v40, %v4015_v36 }
 0x338   :  { %v4017_v41 = vrot.slane %v3506_v2, 2  ;;  %v1769_v17 = vrot.slane %v3506_v2, 3  ;;  %v4021_v18 = vrot.slane %v3508_v44, 4  ;;  %v1522_v39 = vpop.f32.mrb[35].mxu1 }
 0x339   :  { %1633 = vrot.lane.b32.xlu0 %v1608_v1, %s3063_s3  ;;  %v1876_v34 = vrot.slane %v1522_v39, 4  ;;  %v1609_v31 = vsel %vm595_vm4, %v1607_v49, %v1608_v1 }
 0x33a   :  { %1631 = vrot.lane.b32.xlu1 %v1609_v31, %s3063_s3  ;;  %v3521_v23 = vpop.f32.mrb[20].mxu0  ;;  %v1770_v40 = vsel %vm1767_vm13, %v1768_v10, %v1769_v17  ;;  %v3527_v26 = vsel %vm684_vm5, %v1711_v58, %v4017_v41 }
 0x33b   :  { %v1365_v36 = vpop.f32.mrb[21].mxu0  ;;  %v3529_v15 = vpop.f32.mrb[36].mxu1  ;;  %v3534_v39 = vsel %vm1872_vm12, %v1876_v34, %v4021_v18  ;;  %v1610_v58 = vrot.slane %v3521_v23, 1 }
 0x33c   :  { %v4026_v49 = vrot.slane %v3529_v15, 4  ;;  %v1532_v31 = vpop.f32.mrb[37].mxu1  ;;  %v1714_v41 = vrot.slane %v1365_v36, 2 }
 0x33d   :  { %1794 = vrot.lane.b32.xlu0 %v1769_v17, %s3063_s3  ;;  %v1879_v1 = vrot.slane %v1532_v31, 4  ;;  %v1771_v17 = vrot.slane %v1365_v36, 3 }
 0x33e   :  { %1792 = vrot.lane.b32.xlu1 %v1770_v40, %s3063_s3  ;;  %v3539_v10 = vpop.f32.mrb[22].mxu0 }
 0x33f   :  { %v1611_v30 = vrot.slane %v3539_v10, 1  ;;  %v3543_v7 = vpop.f32.mrb[23].mxu0  ;;  %v3545_v22 = vpop.f32.mrb[38].mxu1  ;;  %v3550_v34 = vsel %vm1872_vm12, %v1879_v1, %v4026_v49 }
 0x340   :  { %v4029_v31 = vrot.slane %v3543_v7, 2  ;;  %v1772_v40 = vrot.slane %v3543_v7, 3  ;;  %v4032_v18 = vrot.slane %v3545_v22, 4  ;;  %v1542_v63 = vpop.f32.mrb[39].mxu1 }
 0x341   :  { %1637 = vrot.lane.b32.xlu0 %v1611_v30, %s3063_s3  ;;  %v1612_v14 = vsel %vm595_vm4, %v1610_v58, %v1611_v30  ;;  %v1882_v55 = vrot.slane %v1542_v63, 4 }
 0x342   :  { %1635 = vrot.lane.b32.xlu1 %v1612_v14, %s3063_s3  ;;  %v3558_v6 = vpop.f32.mrb[24].mxu0  ;;  %v1773_v1 = vsel %vm1767_vm13, %v1771_v17, %v1772_v40  ;;  %v3564_v36 = vsel %vm684_vm5, %v1714_v41, %v4029_v31 }
 0x343   :  { %v1377_v49 = vpop.f32.mrb[25].mxu0  ;;  %v3566_v47 = vpop.f32.mrb[40].mxu1  ;;  %v3571_v37 = vsel %vm1872_vm12, %v1882_v55, %v4032_v18  ;;  %v1613_v41 = vrot.slane %v3558_v6, 1 }
 0x344   :  { %4069 = vst [vmem:[#allocation16_spill] sm:$0xff] %v3566_v47  ;;  %v4037_v63 = vrot.slane %v3566_v47, 4  ;;  %v1552_v14 = vpop.f32.mrb[41].mxu1  ;;  %v1717_v17 = vrot.slane %v1377_v49, 2 }
 0x345   :  { %1798 = vrot.lane.b32.xlu0 %v1772_v40, %s3063_s3  ;;  %v1885_v30 = vrot.slane %v1552_v14, 4  ;;  %v1774_v40 = vrot.slane %v1377_v49, 3 }
 0x346   :  { %1796 = vrot.lane.b32.xlu1 %v1773_v1, %s3063_s3  ;;  %v3576_v58 = vpop.f32.mrb[26].mxu0 }
 0x347   :  { %v1614_v31 = vrot.slane %v3576_v58, 1  ;;  %v3580_v62 = vpop.f32.mrb[27].mxu0  ;;  %v3582_v54 = vpop.f32.mrb[42].mxu1  ;;  %v3587_v55 = vsel %vm1872_vm12, %v1885_v30, %v4037_v63 }
 0x348   :  { %4070 = vst [vmem:[#allocation17_spill] sm:$0xff] %v3582_v54  ;;  %4071 = vst [vmem:[#allocation18_spill] sm:$0xff] %v3587_v55  ;;  %v4040_v14 = vrot.slane %v3580_v62, 2  ;;  %v1775_v1 = vrot.slane %v3580_v62, 3  ;;  %v4043_v18 = vrot.slane %v3582_v54, 4  ;;  %v1562_v46 = vpop.f32.mrb[43].mxu1 }
 0x349   :  { %1641 = vrot.lane.b32.xlu0 %v1614_v31, %s3063_s3  ;;  %v1615_v32 = vsel %vm595_vm4, %v1613_v41, %v1614_v31  ;;  %v1888_v24 = vrot.slane %v1562_v46, 4 }
 0x34a   :  { %1639 = vrot.lane.b32.xlu1 %v1615_v32, %s3063_s3  ;;  %v3595_v16 = vpop.f32.mrb[28].mxu0  ;;  %v1776_v30 = vsel %vm1767_vm13, %v1774_v40, %v1775_v1  ;;  %v3601_v49 = vsel %vm684_vm5, %v1717_v17, %v4040_v14 }
 0x34b   :  { %v1389_v63 = vpop.f32.mrb[29].mxu0  ;;  %v3603_v8 = vpop.f32.mrb[44].mxu1  ;;  %v3608_v0 = vsel %vm1872_vm12, %v1888_v24, %v4043_v18  ;;  %v1616_v17 = vrot.slane %v3595_v16, 1 }
 0x34c   :  { %4072 = vst [vmem:[#allocation19_spill] sm:$0xff] %v3603_v8  ;;  %4073 = vst [vmem:[#allocation20_spill] sm:$0xff] %v3608_v0  ;;  %v4046_v46 = vrot.slane %v3603_v8, 4  ;;  %v1572_v32 = vpop.f32.mrb[45].mxu1  ;;  %v1720_v40 = vrot.slane %v1389_v63, 2 }
 0x34d   :  { %1802 = vrot.lane.b32.xlu0 %v1775_v1, %s3063_s3  ;;  %v1891_v31 = vrot.slane %v1572_v32, 4  ;;  %v1777_v1 = vrot.slane %v1389_v63, 3 }
 0x34e   :  { %1800 = vrot.lane.b32.xlu1 %v1776_v30, %s3063_s3  ;;  %v3613_v41 = vpop.f32.mrb[30].mxu0 }
 0x34f   :  { %v1617_v14 = vrot.slane %v3613_v41, 1  ;;  %v3617_v56 = vpop.f32.mrb[31].mxu0  ;;  %v3619_v48 = vpop.f32.mrb[46].mxu1  ;;  %v3624_v24 = vsel %vm1872_vm12, %v1891_v31, %v4046_v46 }
 0x350   :  { %4074 = vst [vmem:[#allocation21_spill] sm:$0xff] %v3619_v48  ;;  %4075 = vst [vmem:[#allocation22_spill] sm:$0xff] %v3624_v24  ;;  %v4047_v32 = vrot.slane %v3617_v56, 2  ;;  %v1778_v30 = vrot.slane %v3617_v56, 3  ;;  %v4049_v18 = vrot.slane %v3619_v48, 4  ;;  %v1582_v38 = vpop.f32.mrb[47].mxu1 }
 0x351   :  { %1645 = vrot.lane.b32.xlu0 %v1617_v14, %s3063_s3  ;;  %v1618_v0 = vsel %vm595_vm4, %v1616_v17, %v1617_v14  ;;  %v1894_v54 = vrot.slane %v1582_v38, 4 }
 0x352   :  { %1643 = vrot.lane.b32.xlu1 %v1618_v0, %s3063_s3  ;;  %v3632_v55 = vpop.f32.mrb[32].mxu0  ;;  %v1779_v31 = vsel %vm1767_vm13, %v1777_v1, %v1778_v30  ;;  %v3638_v63 = vsel %vm684_vm5, %v1720_v40, %v4047_v32 }
 0x353   :  { %v1401_v46 = vpop.f32.mrb[33].mxu0  ;;  %v3643_v24 = vsel %vm1872_vm12, %v1894_v54, %v4049_v18  ;;  %v1619_v0 = vrot.slane %v3632_v55, 1 }
 0x354   :  { %4076 = vst [vmem:[#allocation23_spill] sm:$0xff] %v3643_v24  ;;  %v1723_v40 = vrot.slane %v1401_v46, 2  ;;  %v1780_v1 = vrot.slane %v1401_v46, 3 }
 0x355   :  { %1806 = vrot.lane.b32.xlu0 %v1778_v30, %s3063_s3 }
 0x356   :  { %1804 = vrot.lane.b32.xlu1 %v1779_v31, %s3063_s3  ;;  %v3647_v38 = vpop.f32.mrb[34].mxu0 }
 0x357   :  { %v1620_v14 = vrot.slane %v3647_v38, 1  ;;  %v3651_v17 = vpop.f32.mrb[35].mxu0 }
 0x358   :  { %v4052_v32 = vrot.slane %v3651_v17, 2  ;;  %v1781_v48 = vrot.slane %v3651_v17, 3 }
 0x359   :  { %1649 = vrot.lane.b32.xlu0 %v1620_v14, %s3063_s3  ;;  %v1621_v54 = vsel %vm595_vm4, %v1619_v0, %v1620_v14 }
 0x35a   :  { %1647 = vrot.lane.b32.xlu1 %v1621_v54, %s3063_s3  ;;  %v3658_v30 = vpop.f32.mrb[36].mxu0  ;;  %v1782_v31 = vsel %vm1767_vm13, %v1780_v1, %v1781_v48  ;;  %v3664_v18 = vsel %vm684_vm5, %v1723_v40, %v4052_v32 }
 0x35b   :  { %4077 = vst [vmem:[#allocation24_spill] sm:$0xff] %v3658_v30  ;;  %4078 = vst [vmem:[#allocation25_spill] sm:$0xff] %v3664_v18  ;;  %v1413_v46 = vpop.f32.mrb[37].mxu0  ;;  %v1622_v0 = vrot.slane %v3658_v30, 1 }
 0x35c   :  { %v1726_v8 = vrot.slane %v1413_v46, 2  ;;  %v1783_v1 = vrot.slane %v1413_v46, 3 }
 0x35d   :  { %1810 = vrot.lane.b32.xlu0 %v1781_v48, %s3063_s3 }
 0x35e   :  { %1808 = vrot.lane.b32.xlu1 %v1782_v31, %s3063_s3  ;;  %v3668_v24 = vpop.f32.mrb[38].mxu0 }
 0x35f   :  { %4079 = vst [vmem:[#allocation26_spill] sm:$0xff] %v3668_v24  ;;  %v1623_v14 = vrot.slane %v3668_v24, 1  ;;  %v3672_v54 = vpop.f32.mrb[39].mxu0 }
 0x360   :  { %4080 = vst [vmem:[#allocation27_spill] sm:$0xff] %v3672_v54  ;;  %v4056_v47 = vrot.slane %v3672_v54, 2  ;;  %v1784_v40 = vrot.slane %v3672_v54, 3 }
 0x361   :  { %1653 = vrot.lane.b32.xlu0 %v1623_v14, %s3063_s3  ;;  %v1624_v48 = vsel %vm595_vm4, %v1622_v0, %v1623_v14 }
 0x362   :  { %1651 = vrot.lane.b32.xlu1 %v1624_v48, %s3063_s3  ;;  %v3679_v31 = vpop.f32.mrb[40].mxu0  ;;  %v1785_v32 = vsel %vm1767_vm13, %v1783_v1, %v1784_v40  ;;  %v3685_v30 = vsel %vm684_vm5, %v1726_v8, %v4056_v47 }
 0x363   :  { %4081 = vst [vmem:[#allocation28_spill] sm:$0xff] %v3679_v31  ;;  %4082 = vst [vmem:[#allocation29_spill] sm:$0xff] %v3685_v30  ;;  %v1425_v46 = vpop.f32.mrb[41].mxu0  ;;  %v1625_v0 = vrot.slane %v3679_v31, 1 }
 0x364   :  { %v1729_v18 = vrot.slane %v1425_v46, 2  ;;  %v1786_v1 = vrot.slane %v1425_v46, 3 }
 0x365   :  { %1814 = vrot.lane.b32.xlu0 %v1784_v40, %s3063_s3 }
 0x366   :  { %1812 = vrot.lane.b32.xlu1 %v1785_v32, %s3063_s3  ;;  %v3689_v24 = vpop.f32.mrb[42].mxu0 }
 0x367   :  { %4083 = vst [vmem:[#allocation30_spill] sm:$0xff] %v3689_v24  ;;  %v1626_v14 = vrot.slane %v3689_v24, 1  ;;  %v3693_v48 = vpop.f32.mrb[43].mxu0 }
 0x368   :  { %4084 = vst [vmem:[#allocation31_spill] sm:$0xff] %v3693_v48  ;;  %v4060_v54 = vrot.slane %v3693_v48, 2  ;;  %v1787_v8 = vrot.slane %v3693_v48, 3 }
 0x369   :  { %1657 = vrot.lane.b32.xlu0 %v1626_v14, %s3063_s3  ;;  %v1627_v40 = vsel %vm595_vm4, %v1625_v0, %v1626_v14 }
 0x36a   :  { %1655 = vrot.lane.b32.xlu1 %v1627_v40, %s3063_s3  ;;  %v3700_v32 = vpop.f32.mrb[44].mxu0  ;;  %v1788_v47 = vsel %vm1767_vm13, %v1786_v1, %v1787_v8  ;;  %v3706_v31 = vsel %vm684_vm5, %v1729_v18, %v4060_v54 }
 0x36b   :  { %v1437_v46 = vpop.f32.mrb[45].mxu0  ;;  %v1628_v0 = vrot.slane %v3700_v32, 1 }
 0x36c   :  { %v1732_v30 = vrot.slane %v1437_v46, 2  ;;  %v1789_v1 = vrot.slane %v1437_v46, 3  ;;  %v4085_v46 = vrot.slane %v3297_v42, 1 }
 0x36d   :  { %1818 = vrot.lane.b32.xlu0 %v1787_v8, %s3063_s3 }
 0x36e   :  { %1816 = vrot.lane.b32.xlu1 %v1788_v47, %s3063_s3  ;;  %v3710_v24 = vpop.f32.mrb[46].mxu0 }
 0x36f   :  { %v1629_v14 = vrot.slane %v3710_v24, 1  ;;  %v3714_v40 = vpop.f32.mrb[47].mxu0 }
 0x370   :  { %v1733_v48 = vrot.slane %v3714_v40, 2  ;;  %v1790_v18 = vrot.slane %v3714_v40, 3 }
 0x371   :  { %1661 = vrot.lane.b32.xlu0 %v1629_v14, %s3063_s3  ;;  %v1630_v8 = vsel %vm595_vm4, %v1628_v0, %v1629_v14  ;;  %v2130_v0 = vpop.f32.mrb[48].mxu1  ;;  %vm2235_vm4 = vcmask 1045509  }
 0x372   :  { %1659 = vrot.lane.b32.xlu1 %v1630_v8, %s3063_s3  ;;  %v1791_v47 = vsel %vm1767_vm13, %v1789_v1, %v1790_v18  ;;  %v3725_v54 = vsel %vm684_vm5, %v1732_v30, %v1733_v48  ;;  %v2853_v14 = vpop.f32.mrb[49].mxu1  ;;  %v4086_v1 = vrot.slane %v3312_v51, 1  ;;  %v4087_v8 = vrot.slane %v3330_v59, 1 }
 0x373   :  { %v3739_v30 = vpop.f32.mrb[50].mxu1  ;;  %vm2237_vm5 = vcmask 1046534  }
 0x375   :  { %1822 = vrot.lane.b32.xlu0 %v1790_v18, %s3063_s3  ;;  %v2858_v18 = vpop.f32.mrb[51].mxu1 }
 0x376   :  { %1820 = vrot.lane.b32.xlu1 %v1791_v47, %s3063_s3  ;;  %v4090_v47 = vrot.slane %v3348_v3, 1 }
 0x379   :  { %626 = vrot.lane.b32.xlu0 %v4085_v46, %s3061_s5  ;;  %v3793_v46 = vpop.permute.xlu1 %620 }
 0x37a   :  { %624 = vrot.lane.b32.xlu1 %v3317_v52, %s3061_s5  ;;  %v4088_v52 = vrot.slane %v3288_v35, 2 }
 0x37d   :  { %630 = vrot.lane.b32.xlu0 %v4086_v1, %s3061_s5 }
 0x37e   :  { %628 = vrot.lane.b32.xlu1 %v3335_v60, %s3061_s5  ;;  %v4089_v60 = vrot.slane %v3297_v42, 2 }
 0x381   :  { %634 = vrot.lane.b32.xlu0 %v4087_v8, %s3061_s5  ;;  %v4099_v8 = vrot.slane %v3506_v2, 2 }
 0x382   :  { %632 = vrot.lane.b32.xlu1 %v3353_v4, %s3061_s5  ;;  %v4091_v4 = vrot.slane %v3312_v51, 2 }
 0x385   :  { %711 = vrot.lane.b32.xlu0 %v4088_v52, %s3063_s3 }
 0x386   :  { %709 = vrot.lane.b32.xlu1 %v3303_v45, %s3063_s3  ;;  %v4092_v45 = vrot.slane %v3366_v11, 1 }
 0x389   :  { %715 = vrot.lane.b32.xlu0 %v4089_v60, %s3063_s3 }
 0x38a   :  { %713 = vrot.lane.b32.xlu1 %v3322_v53, %s3063_s3  ;;  %v4093_v53 = vrot.slane %v3330_v59, 2 }
 0x38d   :  { %638 = vrot.lane.b32.xlu0 %v4090_v47, %s3061_s5 }
 0x38e   :  { %636 = vrot.lane.b32.xlu1 %v3371_v12, %s3061_s5  ;;  %v4094_v12 = vrot.slane %v3384_v19, 1 }
 0x391   :  { %719 = vrot.lane.b32.xlu0 %v4091_v4, %s3063_s3 }
 0x392   :  { %717 = vrot.lane.b32.xlu1 %v3340_v61, %s3063_s3  ;;  %v4095_v61 = vrot.slane %v3348_v3, 2 }
 0x395   :  { %642 = vrot.lane.b32.xlu0 %v4092_v45, %s3061_s5  ;;  %v3810_v45 = vld [vmem:[#allocation2 + $0xb8] ss:$0 sm:$0xff] }
 0x396   :  { %640 = vrot.lane.b32.xlu1 %v3389_v20, %s3061_s5  ;;  %v4096_v20 = vrot.slane %v3402_v27, 1 }
 0x399   :  { %723 = vrot.lane.b32.xlu0 %v4093_v53, %s3063_s3  ;;  %v4101_v53 = vrot.slane %v3499_v33, 4 }
 0x39a   :  { %721 = vrot.lane.b32.xlu1 %v3358_v5, %s3063_s3  ;;  %v3791_v5 = vpop.permute.xlu0 %622 }
 0x39d   :  { %646 = vrot.lane.b32.xlu0 %v4094_v12, %s3061_s5 }
 0x39e   :  { %644 = vrot.lane.b32.xlu1 %v3407_v28, %s3061_s5  ;;  %v4097_v28 = vrot.slane %v3366_v11, 2 }
 0x3a1   :  { %727 = vrot.lane.b32.xlu0 %v4095_v61, %s3063_s3 }
 0x3a2   :  { %725 = vrot.lane.b32.xlu1 %v3376_v13, %s3063_s3 }
 0x3a5   :  { %650 = vrot.lane.b32.xlu0 %v4096_v20, %s3061_s5 }
 0x3a6   :  { %648 = vrot.lane.b32.xlu1 %v3423_v50, %s3061_s5  ;;  %v4098_v50 = vrot.slane %v3384_v19, 2 }
 0x3a9   :  { %731 = vrot.lane.b32.xlu0 %v4097_v28, %s3063_s3  ;;  %v2273_v28 = vld [vmem:[#allocation2 + $0xd0] sm:$0xff] }
 0x3aa   :  { %729 = vrot.lane.b32.xlu1 %v3394_v21, %s3063_s3 }
 0x3ab   :  { %v1634_v14 = vpop.permute.xlu0 %1633 }
 0x3ac   :  { %v1680_v13 = vadd.f32 %v1634_v14, %v3502_v43  ;;  %v1632_v1 = vpop.permute.xlu1 %1631  ;;  %v2274_v14 = vld [vmem:[#allocation2 + $0xd8] sm:$0xff] }
 0x3ad   :  { %v1679_v18 = vadd.f32 %v1632_v1, %v3497_v25  ;;  %735 = vrot.lane.b32.xlu0 %v4098_v50, %s3063_s3  ;;  %v4100_v25 = vrot.slane %v3402_v27, 2 }
 0x3ae   :  { %733 = vrot.lane.b32.xlu1 %v3412_v29, %s3063_s3  ;;  %v1752_v52 = vadd.f32 %v4099_v8, %v1680_v13  ;;  %v2275_v13 = vld [vmem:[#allocation2 + $0xe0] sm:$0xff] }
 0x3af   :  { %v1795_v60 = vpop.permute.xlu0 %1794  ;;  %v1751_v47 = vadd.f32 %v3527_v26, %v1679_v18  ;;  %v2961_v18 = vpack.c.bf16 %v2274_v14, %v2273_v28 }
 0x3b0   :  { %v1841_v21 = vadd.f32 %v1795_v60, %v1752_v52  ;;  %v1793_v4 = vpop.permute.xlu1 %1792 }
 0x3b1   :  { %v1840_v43 = vadd.f32 %v1793_v4, %v1751_v47  ;;  %739 = vrot.lane.b32.xlu0 %v4100_v25, %s3063_s3  ;;  %2962 = vmatpush3.bf16.msra.mxu0 %v2961_v18  ;;  %v2278_v25 = vld [vmem:[#allocation2 + $0xf8] sm:$0xff] }
 0x3b2   :  { %v1914_v12 = vadd.f32 %v4101_v53, %v1841_v21  ;;  %737 = vrot.lane.b32.xlu1 %v3428_v57, %s3063_s3  ;;  %v2276_v57 = vld [vmem:[#allocation2 + $0xe8] sm:$0xff] }
 0x3b3   :  { %v1913_v29 = vadd.f32 %v3513_v9, %v1840_v43  ;;  %v1638_v2 = vpop.permute.xlu0 %1637  ;;  %v4102_v9 = vrot.slane %v3543_v7, 2  ;;  %v2964_v47 = vpack.c.bf16 %v2276_v57, %v2275_v13  ;;  %v4104_v7 = vrot.slane %v3508_v44, 4 }
 0x3b4   :  { %v1934_v26 = vadd.f32 %v3810_v45, %v1914_v12  ;;  %v1682_v61 = vadd.f32 %v1638_v2, %v3539_v10  ;;  %v1636_v20 = vpop.permute.xlu1 %1635 }
 0x3b5   :  { %v1933_v1 = vadd.f32 %v3810_v45, %v1913_v29  ;;  %v1681_v33 = vadd.f32 %v1636_v20, %v3521_v23  ;;  %2261 = vrot.lane.b32.xlu0 %v2130_v0, %s3061_s5  ;;  %v4103_v23 = vmov 0.0|0.0   ;;  %v2277_v0 = vld [vmem:[#allocation2 + $0xf0] sm:$0xff] }
 0x3b6   :  { %v1950_v50 = vmax.f32 %v1934_v26, 0.0  ;;  %v1754_v8 = vadd.f32 %v4102_v9, %v1682_v61  ;;  %2963 = vmatprep.subr.bf16.mxu0 %v4103_v23  ;;  %v2967_v61 = vpack.c.bf16 %v2278_v25, %v2277_v0 }
 0x3b7   :  { %v1949_v52 = vmax.f32 %v1933_v1, 0.0  ;;  %v1799_v10 = vpop.permute.xlu0 %1798  ;;  %v1753_v60 = vadd.f32 %v3564_v36, %v1681_v33  ;;  %2965 = vmatpush3.bf16.msra.mxu0 %v2964_v47  ;;  %v2279_v1 = vld [vmem:[#allocation2 + $0x100] sm:$0xff]  ;;  %v2280_v33 = vld [vmem:[#allocation2 + $0x108] sm:$0xff] }
 0x3b8   :  { %v1968_v21 = vsel %vm1967_vm14, %v1950_v50, -inf  ;;  %v1843_v4 = vadd.f32 %v1799_v10, %v1754_v8  ;;  %v1797_v43 = vpop.permute.xlu1 %1796  ;;  %2966 = vmatprep.subr.bf16.mxu0 %v4103_v23 }
 0x3b9   :  { %v1966_v53 = vsel %vm1965_vm15, %v1949_v52, -inf  ;;  %v1842_v12 = vadd.f32 %v1797_v43, %v1753_v60  ;;  %v2282_v43 = vld [vmem:[#allocation2 + $0x118] sm:$0xff] }
 0x3ba   :  { %v1969_v29 = vmax.f32 %v1966_v53, %v1968_v21  ;;  %v1916_v2 = vadd.f32 %v4104_v7, %v1843_v4  ;;  %v2281_v4 = vld [vmem:[#allocation2 + $0x110] sm:$0xff]  ;;  %v4106_v53 = vrot.slane %v3529_v15, 4 }
 0x3bb   :  { %v1915_v26 = vadd.f32 %v3534_v39, %v1842_v12  ;;  %v1642_v36 = vpop.permute.xlu0 %1641  ;;  %v4105_v39 = vrot.slane %v3580_v62, 2  ;;  %2968 = vmatpush3.bf16.msra.mxu0 %v2967_v61  ;;  %v2973_v7 = vpack.c.bf16 %v2282_v43, %v2281_v4  ;;  %v4108_v4 = vrot.slane %v3545_v22, 4 }
 0x3bc   :  { %v1970_v20 = vrot.slane %v1969_v29, 4  ;;  %v1936_v28 = vadd.f32 %v3810_v45, %v1916_v2  ;;  %v1684_v14 = vadd.f32 %v1642_v36, %v3576_v58  ;;  %v1640_v13 = vpop.permute.xlu1 %1639  ;;  %v2970_v58 = vpack.c.bf16 %v2280_v33, %v2279_v1  ;;  %2969 = vmatprep.subr.bf16.mxu0 %v4103_v23 }
 0x3bd   :  { %v1935_v18 = vadd.f32 %v3810_v45, %v1915_v26  ;;  %v1683_v44 = vadd.f32 %v1640_v13, %v3558_v6  ;;  %v4107_v33 = vrot.slane %v3617_v56, 2 }
 0x3be   :  { %v1971_v57 = vmax.f32 %v1969_v29, %v1970_v20  ;;  %v1952_v50 = vmax.f32 %v1936_v28, 0.0  ;;  %v1756_v9 = vadd.f32 %v4105_v39, %v1684_v14  ;;  %v2283_v20 = vld [vmem:[#allocation2 + $0x120] sm:$0xff]  ;;  %v2284_v28 = vld [vmem:[#allocation2 + $0x128] sm:$0xff] }
 0x3bf   :  { %v1951_v8 = vmax.f32 %v1935_v18, 0.0  ;;  %v1803_v52 = vpop.permute.xlu0 %1802  ;;  %v1755_v10 = vadd.f32 %v3601_v49, %v1683_v44  ;;  %2971 = vmatpush3.bf16.msra.mxu0 %v2970_v58 }
 0x3c0   :  { %v1977_v60 = vsel %vm1967_vm14, %v1952_v50, -inf  ;;  %v1845_v47 = vadd.f32 %v1803_v52, %v1756_v9  ;;  %v1801_v21 = vpop.permute.xlu1 %1800  ;;  %v1972_v6 = vrot.slane %v1971_v57, 2  ;;  %2972 = vmatprep.subr.bf16.mxu0 %v4103_v23 }
 0x3c1   :  { %v1976_v0 = vsel %vm1965_vm15, %v1951_v8, -inf  ;;  %v1844_v25 = vadd.f32 %v1801_v21, %v1755_v10  ;;  %v2285_v10 = vld [vmem:[#allocation2 + $0x130] sm:$0xff] }
 0x3c2   :  { %v1978_v62 = vmax.f32 %v1976_v0, %v1977_v60  ;;  %v1918_v12 = vadd.f32 %v4106_v53, %v1845_v47  ;;  %v1973_v14 = vmax.f32 %v1971_v57, %v1972_v6 }
 0x3c3   :  { %v1917_v49 = vadd.f32 %v3550_v34, %v1844_v25  ;;  %v1646_v29 = vpop.permute.xlu0 %1645  ;;  %2974 = vmatpush3.bf16.msra.mxu0 %v2973_v7  ;;  %v2288_v7 = vld [vmem:[#allocation2 + $0x148] sm:$0xff] }
 0x3c4   :  { %v1979_v2 = vrot.slane %v1978_v62, 4  ;;  %v1938_v26 = vadd.f32 %v3810_v45, %v1918_v12  ;;  %v1686_v36 = vadd.f32 %v1646_v29, %v3613_v41  ;;  %v1644_v61 = vpop.permute.xlu1 %1643  ;;  %v2976_v41 = vpack.c.bf16 %v2284_v28, %v2283_v20  ;;  %2975 = vmatprep.subr.bf16.mxu0 %v4103_v23  ;;  %v2287_v29 = vld [vmem:[#allocation2 + $0x140] sm:$0xff] }
 0x3c5   :  { %v1937_v13 = vadd.f32 %v3810_v45, %v1917_v49  ;;  %v1685_v15 = vadd.f32 %v1644_v61, %v3595_v16  ;;  %v2286_v16 = vld [vmem:[#allocation2 + $0x138] sm:$0xff]  ;;  %v1974_v58 = vrot.slane %v1973_v14, 1  ;;  %v4109_v20 = vrot.slane %v3651_v17, 2 }
 0x3c6   :  { %v1980_v1 = vmax.f32 %v1978_v62, %v1979_v2  ;;  %v1954_v34 = vmax.f32 %v1938_v26, 0.0  ;;  %v1758_v18 = vadd.f32 %v4107_v33, %v1686_v36  ;;  %v2979_v0 = vpack.c.bf16 %v2286_v16, %v2285_v10 }
 0x3c7   :  { %v1953_v44 = vmax.f32 %v1937_v13, 0.0  ;;  %v1807_v50 = vpop.permute.xlu0 %1806  ;;  %v1757_v39 = vadd.f32 %v3638_v63, %v1685_v15  ;;  %2977 = vmatpush3.bf16.msra.mxu0 %v2976_v41  ;;  %v1975_v2 = vmax.f32 %v1973_v14, %v1974_v58 }
 0x3c8   :  { %v1981_v9 = vrot.slane %v1980_v1, 2  ;;  %v1986_v8 = vsel %vm1967_vm14, %v1954_v34, -inf  ;;  %v1847_v52 = vadd.f32 %v1807_v50, %v1758_v18  ;;  %v1805_v57 = vpop.permute.xlu1 %1804  ;;  %2978 = vmatprep.subr.bf16.mxu0 %v4103_v23  ;;  %v2982_v34 = vpack.c.bf16 %v2288_v7, %v2287_v29 }
 0x3c9   :  { %v1985_v60 = vsel %vm1965_vm15, %v1953_v44, -inf  ;;  %v1846_v56 = vadd.f32 %v1805_v57, %v1757_v39  ;;  %v4113_v57 = vld [vmem:[#allocation18_spill] sm:$0xff] }
 0x3ca   :  { %v1982_v47 = vmax.f32 %v1980_v1, %v1981_v9  ;;  %v1987_v21 = vmax.f32 %v1985_v60, %v1986_v8  ;;  %v1920_v63 = vadd.f32 %v4108_v4, %v1847_v52  ;;  %v4111_v9 = vld [vmem:[#allocation16_spill] sm:$0xff] }
 0x3cb   :  { %v1919_v43 = vadd.f32 %v3571_v37, %v1846_v56  ;;  %v1650_v6 = vpop.permute.xlu0 %1649  ;;  %2980 = vmatpush3.bf16.msra.mxu0 %v2979_v0  ;;  %v4112_v8 = vrot.slane %v4111_v9, 4 }
 0x3cc   :  { %v1983_v25 = vrot.slane %v1982_v47, 1  ;;  %v1988_v62 = vrot.slane %v1987_v21, 4  ;;  %v1940_v53 = vadd.f32 %v3810_v45, %v1920_v63  ;;  %v1688_v12 = vadd.f32 %v1650_v6, %v3647_v38  ;;  %v1648_v49 = vpop.permute.xlu1 %1647  ;;  %v4110_v38 = vld [vmem:[#allocation25_spill] sm:$0xff]  ;;  %2981 = vmatprep.subr.bf16.mxu0 %v4103_v23 }
 0x3cd   :  { %v1939_v22 = vadd.f32 %v3810_v45, %v1919_v43  ;;  %v1687_v26 = vadd.f32 %v1648_v49, %v3632_v55  ;;  %v4115_v43 = vld [vmem:[#allocation24_spill] sm:$0xff] }
 0x3ce   :  { %v1984_v37 = vmax.f32 %v1982_v47, %v1983_v25  ;;  %v1989_v36 = vmax.f32 %v1987_v21, %v1988_v62  ;;  %v1956_v61 = vmax.f32 %v1940_v53, 0.0  ;;  %v1760_v28 = vadd.f32 %v4109_v20, %v1688_v12  ;;  %v4114_v47 = vld [vmem:[#allocation26_spill] sm:$0xff]  ;;  %v4116_v53 = vld [vmem:[#allocation27_spill] sm:$0xff] }
 0x3cf   :  { %v1955_v13 = vmax.f32 %v1939_v22, 0.0  ;;  %v1811_v15 = vpop.permute.xlu0 %1810  ;;  %v1759_v1 = vadd.f32 %v4110_v38, %v1687_v26  ;;  %2983 = vmatpush3.bf16.msra.mxu0 %v2982_v34  ;;  %v4117_v12 = vrot.slane %v4116_v53, 2 }
 0x3d0   :  { %v1990_v33 = vrot.slane %v1989_v36, 2  ;;  %v1995_v14 = vsel %vm1967_vm14, %v1956_v61, -inf  ;;  %v1849_v18 = vadd.f32 %v1811_v15, %v1760_v28  ;;  %v1809_v44 = vpop.permute.xlu1 %1808  ;;  %v2250_v55 = vsel %vm2227_vm0, %v1984_v37, %v1975_v2  ;;  %v4118_v2 = vld [vmem:[#allocation29_spill] sm:$0xff] }
 0x3d1   :  { %v1994_v50 = vsel %vm1965_vm15, %v1955_v13, -inf  ;;  %v1848_v39 = vadd.f32 %v1809_v44, %v1759_v1  ;;  %v4119_v1 = vld [vmem:[#allocation17_spill] sm:$0xff] }
 0x3d2   :  { %v1991_v17 = vmax.f32 %v1989_v36, %v1990_v33  ;;  %v1996_v41 = vmax.f32 %v1994_v50, %v1995_v14  ;;  %v1922_v52 = vadd.f32 %v4112_v8, %v1849_v18  ;;  %v4120_v34 = vrot.slane %v4119_v1, 4  ;;  %v4121_v14 = vld [vmem:[#allocation20_spill] sm:$0xff] }
 0x3d3   :  { %v1921_v10 = vadd.f32 %v4113_v57, %v1848_v39  ;;  %v1654_v16 = vpop.permute.xlu0 %1653 }
 0x3d4   :  { %v1992_v58 = vrot.slane %v1991_v17, 1  ;;  %v1997_v60 = vrot.slane %v1996_v41, 4  ;;  %v1942_v56 = vadd.f32 %v3810_v45, %v1922_v52  ;;  %v1690_v21 = vadd.f32 %v1654_v16, %v4114_v47  ;;  %v1652_v4 = vpop.permute.xlu1 %1651  ;;  %v4123_v52 = vld [vmem:[#allocation28_spill] sm:$0xff] }
 0x3d5   :  { %v1941_v63 = vadd.f32 %v3810_v45, %v1921_v10  ;;  %v1689_v6 = vadd.f32 %v1652_v4, %v4115_v43 }
 0x3d6   :  { %v1993_v0 = vmax.f32 %v1991_v17, %v1992_v58  ;;  %v1998_v25 = vmax.f32 %v1996_v41, %v1997_v60  ;;  %v1958_v62 = vmax.f32 %v1942_v56, 0.0  ;;  %v1762_v49 = vadd.f32 %v4117_v12, %v1690_v21  ;;  %v4122_v41 = vld [vmem:[#allocation30_spill] sm:$0xff]  ;;  %v4124_v60 = vld [vmem:[#allocation31_spill] sm:$0xff] }
 0x3d7   :  { %v1957_v29 = vmax.f32 %v1941_v63, 0.0  ;;  %v1815_v7 = vpop.permute.xlu0 %1814  ;;  %v1761_v22 = vadd.f32 %v4118_v2, %v1689_v6  ;;  %v4125_v56 = vrot.slane %v4124_v60, 2 }
 0x3d8   :  { %v1999_v26 = vrot.slane %v1998_v25, 2  ;;  %v2004_v37 = vsel %vm1967_vm14, %v1958_v62, -inf  ;;  %v1851_v36 = vadd.f32 %v1815_v7, %v1762_v49  ;;  %v1813_v61 = vpop.permute.xlu1 %1812  ;;  %v2251_v20 = vsel %vm2229_vm2, %v1993_v0, %v2250_v55  ;;  %v4126_v7 = vld [vmem:[#allocation19_spill] sm:$0xff] }
 0x3d9   :  { %v2003_v28 = vsel %vm1965_vm15, %v1957_v29, -inf  ;;  %v1850_v13 = vadd.f32 %v1813_v61, %v1761_v22  ;;  %v4127_v2 = vrot.slane %v4126_v7, 4 }
 0x3da   :  { %v2000_v15 = vmax.f32 %v1998_v25, %v1999_v26  ;;  %v2005_v38 = vmax.f32 %v2003_v28, %v2004_v37  ;;  %v1924_v33 = vadd.f32 %v4120_v34, %v1851_v36  ;;  %v4128_v26 = vld [vmem:[#allocation22_spill] sm:$0xff] }
 0x3db   :  { %v1923_v18 = vadd.f32 %v4121_v14, %v1850_v13  ;;  %v1658_v44 = vpop.permute.xlu0 %1657 }
 0x3dc   :  { %v2001_v50 = vrot.slane %v2000_v15, 1  ;;  %v2006_v39 = vrot.slane %v2005_v38, 4  ;;  %v1944_v17 = vadd.f32 %v3810_v45, %v1924_v33  ;;  %v1692_v9 = vadd.f32 %v1658_v44, %v4122_v41  ;;  %v1656_v8 = vpop.permute.xlu1 %1655 }
 0x3dd   :  { %v1943_v55 = vadd.f32 %v3810_v45, %v1923_v18  ;;  %v1691_v57 = vadd.f32 %v1656_v8, %v4123_v52 }
 0x3de   :  { %v2002_v10 = vmax.f32 %v2000_v15, %v2001_v50  ;;  %v2007_v16 = vmax.f32 %v2005_v38, %v2006_v39  ;;  %v1960_v58 = vmax.f32 %v1944_v17, 0.0  ;;  %v1764_v47 = vadd.f32 %v4125_v56, %v1692_v9 }
 0x3df   :  { %v1959_v21 = vmax.f32 %v1943_v55, 0.0  ;;  %v1819_v4 = vpop.permute.xlu0 %1818  ;;  %v1763_v63 = vadd.f32 %v3706_v31, %v1691_v57  ;;  %v4129_v57 = vld [vmem:[#allocation21_spill] sm:$0xff] }
 0x3e0   :  { %v2008_v43 = vrot.slane %v2007_v16, 2  ;;  %v2013_v6 = vsel %vm1967_vm14, %v1960_v58, -inf  ;;  %v1853_v0 = vadd.f32 %v1819_v4, %v1764_v47  ;;  %v1817_v25 = vpop.permute.xlu1 %1816  ;;  %v2252_v62 = vsel %vm2231_vm1, %v2002_v10, %v2251_v20 }
 0x3e1   :  { %v2012_v53 = vsel %vm1965_vm15, %v1959_v21, -inf  ;;  %v1852_v12 = vadd.f32 %v1817_v25, %v1763_v63  ;;  %v4130_v10 = vrot.slane %v4129_v57, 4 }
 0x3e2   :  { %v2009_v49 = vmax.f32 %v2007_v16, %v2008_v43  ;;  %v2014_v29 = vmax.f32 %v2012_v53, %v2013_v6  ;;  %v1926_v22 = vadd.f32 %v4127_v2, %v1853_v0 }
 0x3e3   :  { %v1925_v37 = vadd.f32 %v4128_v26, %v1852_v12  ;;  %v1662_v36 = vpop.permute.xlu0 %1661 }
 0x3e4   :  { %v2010_v61 = vrot.slane %v2009_v49, 1  ;;  %v2015_v31 = vrot.slane %v2014_v29, 4  ;;  %v1946_v28 = vadd.f32 %v3810_v45, %v1926_v22  ;;  %v1694_v13 = vadd.f32 %v1662_v36, %v3710_v24  ;;  %v1660_v15 = vpop.permute.xlu1 %1659 }
 0x3e5   :  { %v1945_v20 = vadd.f32 %v3810_v45, %v1925_v37  ;;  %v1693_v38 = vadd.f32 %v1660_v15, %v3700_v32  ;;  %v669_v37 = vadd.f32 %v3288_v35, %v3791_v5  ;;  %v2582_v5 = vld [vmem:[#allocation2 + $0xc8] ss:$0 sm:$0xff] }
 0x3e6   :  { %v2011_v1 = vmax.f32 %v2009_v49, %v2010_v61  ;;  %v2016_v34 = vmax.f32 %v2014_v29, %v2015_v31  ;;  %v1962_v33 = vmax.f32 %v1946_v28, 0.0  ;;  %v1766_v14 = vadd.f32 %v1733_v48, %v1694_v13  ;;  %v4131_v48 = vld [vmem:[#allocation23_spill] sm:$0xff]  ;;  %v4132_v31 = vld [vmem:[#allocation8_spill] sm:$0xff]  ;;  %v3929_v13 = vld [vmem:[#allocation2 + $0xb0] ss:$0 sm:$0xff] }
 0x3e7   :  { %v1961_v18 = vmax.f32 %v1945_v20, 0.0  ;;  %v1823_v44 = vpop.permute.xlu0 %1822  ;;  %v1765_v50 = vadd.f32 %v3725_v54, %v1693_v38  ;;  %v668_v28 = vadd.f32 %v3793_v46, %v4132_v31 }
 0x3e8   :  { %v2017_v39 = vrot.slane %v2016_v34, 2  ;;  %v2022_v17 = vsel %vm1967_vm14, %v1962_v33, -inf  ;;  %v1855_v24 = vadd.f32 %v1823_v44, %v1766_v14  ;;  %v1821_v41 = vpop.permute.xlu1 %1820  ;;  %v2253_v9 = vsel %vm2233_vm3, %v2011_v1, %v2252_v62  ;;  %v2365_v14 = vld [vmem:[#allocation2 + $0x158] sm:$0xff] }
 0x3e9   :  { %v2021_v32 = vsel %vm1965_vm15, %v1961_v18, -inf  ;;  %v1854_v8 = vadd.f32 %v1821_v41, %v1765_v50  ;;  %v2366_v18 = vld [vmem:[#allocation2 + $0x160] sm:$0xff] }
 0x3ea   :  { %v2018_v55 = vmax.f32 %v2016_v34, %v2017_v39  ;;  %v2023_v52 = vmax.f32 %v2021_v32, %v2022_v17  ;;  %v1928_v40 = vadd.f32 %v4130_v10, %v1855_v24  ;;  %v2985_v39 = vpack.c.bf16 %v2366_v18, %v2365_v14  ;;  %v4133_v17 = vld [vmem:[#allocation9_spill] sm:$0xff] }
 0x3eb   :  { %v1927_v16 = vadd.f32 %v4131_v48, %v1854_v8  ;;  %v627_v58 = vpop.permute.xlu0 %626 }
 0x3ec   :  { %v2019_v60 = vrot.slane %v2018_v55, 1  ;;  %v2024_v54 = vrot.slane %v2023_v52, 4  ;;  %v1948_v56 = vadd.f32 %v3810_v45, %v1928_v40  ;;  %v625_v47 = vpop.permute.xlu1 %624  ;;  %v671_v44 = vadd.f32 %v3297_v42, %v627_v58  ;;  %2986 = vmatpush3.bf16.msra.mxu1 %v2985_v39 }
 0x3ed   :  { %v1947_v21 = vadd.f32 %v3810_v45, %v1927_v16  ;;  %v670_v46 = vadd.f32 %v625_v47, %v4133_v17  ;;  %v2215_v42 = vadd.f32 %v2582_v5, %v3739_v30  ;;  %2987 = vmatprep.subr.bf16.mxu1 %v4103_v23 }
 0x3ee   :  { %v2025_v4 = vmax.f32 %v2023_v52, %v2024_v54  ;;  %v1964_v63 = vmax.f32 %v1948_v56, 0.0  ;;  %v2020_v43 = vmax.f32 %v2018_v55, %v2019_v60 }
 0x3ef   :  { %v1963_v6 = vmax.f32 %v1947_v21, 0.0  ;;  %v631_v0 = vpop.permute.xlu0 %630  ;;  %v2218_v30 = vmax.f32 %v2215_v42, 0.0 }
 0x3f0   :  { %v2026_v25 = vrot.slane %v2025_v4, 2  ;;  %v2031_v62 = vsel %vm1967_vm14, %v1964_v63, -inf  ;;  %v629_v53 = vpop.permute.xlu1 %628  ;;  %v2254_v12 = vsel %vm2235_vm4, %v2020_v43, %v2253_v9  ;;  %v673_v23 = vadd.f32 %v3312_v51, %v631_v0 }
 0x3f1   :  { %v2030_v49 = vsel %vm1965_vm15, %v1963_v6, -inf  ;;  %v4134_v6 = vld [vmem:[#allocation10_spill] sm:$0xff] }
 0x3f2   :  { %v2027_v29 = vmax.f32 %v2025_v4, %v2026_v25  ;;  %v2032_v7 = vmax.f32 %v2030_v49, %v2031_v62  ;;  %v672_v25 = vadd.f32 %v629_v53, %v4134_v6 }
 0x3f3   :  { %v3921_v2 = vpop.permute.xlu0 %634 }
 0x3f4   :  { %v2033_v22 = vrot.slane %v2032_v7, 4  ;;  %v3923_v45 = vpop.permute.xlu1 %632  ;;  %v2028_v26 = vrot.slane %v2027_v29, 1 }
 0x3f6   :  { %v2034_v36 = vmax.f32 %v2032_v7, %v2033_v22  ;;  %v2029_v61 = vmax.f32 %v2027_v29, %v2028_v26 }
 0x3f7   :  { %v712_v15 = vpop.permute.xlu0 %711 }
 0x3f8   :  { %v758_v20 = vadd.f32 %v712_v15, %v669_v37  ;;  %v710_v38 = vpop.permute.xlu1 %709  ;;  %v2035_v1 = vrot.slane %v2034_v36, 2  ;;  %v2255_v34 = vsel %vm2237_vm5, %v2029_v61, %v2254_v12 }
 0x3f9   :  { %v757_v33 = vadd.f32 %v710_v38, %v668_v28  ;;  %v675_v38 = vadd.f32 %v3330_v59, %v3921_v2 }
 0x3fa   :  { %v778_v35 = vadd.f32 %v3929_v13, %v758_v20  ;;  %v2036_v50 = vmax.f32 %v2034_v36, %v2035_v1 }
 0x3fb   :  { %v777_v24 = vadd.f32 %v3929_v13, %v757_v33  ;;  %v716_v41 = vpop.permute.xlu0 %715  ;;  %v4135_v33 = vld [vmem:[#allocation11_spill] sm:$0xff] }
 0x3fc   :  { %v794_v9 = vmax.f32 %v778_v35, 0.0  ;;  %v760_v32 = vadd.f32 %v716_v41, %v671_v44  ;;  %v714_v8 = vpop.permute.xlu1 %713  ;;  %v2037_v55 = vrot.slane %v2036_v50, 1  ;;  %v674_v14 = vadd.f32 %v3923_v45, %v4135_v33 }
 0x3fd   :  { %v793_v52 = vmax.f32 %v777_v24, 0.0  ;;  %v759_v57 = vadd.f32 %v714_v8, %v670_v46 }
 0x3fe   :  { %v812_v10 = vsel %vm811_vm7, %v794_v9, -inf  ;;  %v780_v40 = vadd.f32 %v3929_v13, %v760_v32  ;;  %v2038_v48 = vmax.f32 %v2036_v50, %v2037_v55 }
 0x3ff   :  { %v810_v16 = vsel %vm809_vm6, %v793_v52, -inf  ;;  %v779_v58 = vadd.f32 %v3929_v13, %v759_v57  ;;  %v639_v60 = vpop.permute.xlu0 %638 }
 0x400   :  { %v813_v54 = vmax.f32 %v810_v16, %v812_v10  ;;  %v796_v56 = vmax.f32 %v780_v40, 0.0  ;;  %v637_v47 = vpop.permute.xlu1 %636  ;;  %v2256_v21 = vsel %vm2239_vm8, %v2038_v48, %v2255_v34  ;;  %v677_v10 = vadd.f32 %v3348_v3, %v639_v60  ;;  %v4136_v16 = vld [vmem:[#allocation12_spill] sm:$0xff] }
 0x401   :  { %v795_v4 = vmax.f32 %v779_v58, 0.0  ;;  %2257 = vrot.lane.b32.xlu1 %v2256_v21, %s3064_s1  ;;  %v676_v58 = vadd.f32 %v637_v47, %v4136_v16 }
 0x402   :  { %v814_v63 = vrot.slane %v813_v54, 4  ;;  %v821_v43 = vsel %vm811_vm7, %v796_v56, -inf }
 0x403   :  { %v820_v62 = vsel %vm809_vm6, %v795_v4, -inf  ;;  %v720_v12 = vpop.permute.xlu0 %719 }
 0x404   :  { %v815_v49 = vmax.f32 %v813_v54, %v814_v63  ;;  %v822_v29 = vmax.f32 %v820_v62, %v821_v43  ;;  %v762_v7 = vadd.f32 %v720_v12, %v673_v23  ;;  %v718_v22 = vpop.permute.xlu1 %717 }
 0x405   :  { %v761_v26 = vadd.f32 %v718_v22, %v672_v25  ;;  %2265 = vrot.lane.b32.xlu1 %v2218_v30, %s3065_s13 }
 0x406   :  { %v816_v37 = vrot.slane %v815_v49, 2  ;;  %v823_v36 = vrot.slane %v822_v29, 4  ;;  %v782_v61 = vadd.f32 %v3929_v13, %v762_v7 }
 0x407   :  { %v781_v51 = vadd.f32 %v3929_v13, %v761_v26  ;;  %v643_v0 = vpop.permute.xlu0 %642 }
 0x408   :  { %v817_v31 = vmax.f32 %v815_v49, %v816_v37  ;;  %v824_v28 = vmax.f32 %v822_v29, %v823_v36  ;;  %v798_v53 = vmax.f32 %v782_v61, 0.0  ;;  %v641_v15 = vpop.permute.xlu1 %640  ;;  %v679_v7 = vadd.f32 %v3366_v11, %v643_v0  ;;  %v4137_v36 = vld [vmem:[#allocation13_spill] sm:$0xff]  ;;  %v4138_v0 = vld [vmem:[#allocation14_spill] sm:$0xff] }
 0x409   :  { %v797_v20 = vmax.f32 %v781_v51, 0.0  ;;  %v678_v61 = vadd.f32 %v641_v15, %v4137_v36 }
 0x40a   :  { %v825_v1 = vrot.slane %v824_v28, 2  ;;  %v830_v34 = vsel %vm811_vm7, %v798_v53, -inf  ;;  %v818_v35 = vrot.slane %v817_v31, 1 }
 0x40b   :  { %v829_v18 = vsel %vm809_vm6, %v797_v20, -inf  ;;  %v724_v44 = vpop.permute.xlu0 %723 }
 0x40c   :  { %v826_v5 = vmax.f32 %v824_v28, %v825_v1  ;;  %v831_v50 = vmax.f32 %v829_v18, %v830_v34  ;;  %v764_v39 = vadd.f32 %v724_v44, %v675_v38  ;;  %v722_v17 = vpop.permute.xlu1 %721  ;;  %v819_v32 = vmax.f32 %v817_v31, %v818_v35 }
 0x40d   :  { %v763_v46 = vadd.f32 %v722_v17, %v674_v14 }
 0x40e   :  { %v827_v24 = vrot.slane %v826_v5, 1  ;;  %v832_v41 = vrot.slane %v831_v50, 4  ;;  %v784_v9 = vadd.f32 %v3929_v13, %v764_v39 }
 0x40f   :  { %v783_v59 = vadd.f32 %v3929_v13, %v763_v46  ;;  %v647_v2 = vpop.permute.xlu0 %646 }
 0x410   :  { %v828_v8 = vmax.f32 %v826_v5, %v827_v24  ;;  %v833_v55 = vmax.f32 %v831_v50, %v832_v41  ;;  %v800_v45 = vmax.f32 %v784_v9, 0.0  ;;  %v645_v52 = vpop.permute.xlu1 %644  ;;  %v681_v33 = vadd.f32 %v3384_v19, %v647_v2 }
 0x411   :  { %v799_v57 = vmax.f32 %v783_v59, 0.0  ;;  %v680_v18 = vadd.f32 %v645_v52, %v4138_v0 }
 0x412   :  { %v2228_v42 = vsel %vm2227_vm0, %v828_v8, %v819_v32  ;;  %v834_v40 = vrot.slane %v833_v55, 2  ;;  %v839_v48 = vsel %vm811_vm7, %v800_v45, -inf  ;;  %v4139_v32 = vld [vmem:[#allocation15_spill] sm:$0xff] }
 0x413   :  { %v838_v54 = vsel %vm809_vm6, %v799_v57, -inf  ;;  %v728_v56 = vpop.permute.xlu0 %727 }
 0x414   :  { %v835_v21 = vmax.f32 %v833_v55, %v834_v40  ;;  %v840_v4 = vmax.f32 %v838_v54, %v839_v48  ;;  %v766_v30 = vadd.f32 %v728_v56, %v677_v10  ;;  %v726_v23 = vpop.permute.xlu1 %725 }
 0x415   :  { %v765_v63 = vadd.f32 %v726_v23, %v676_v58 }
 0x416   :  { %v836_v43 = vrot.slane %v835_v21, 1  ;;  %v841_v6 = vrot.slane %v840_v4, 4  ;;  %v786_v25 = vadd.f32 %v3929_v13, %v766_v30 }
 0x417   :  { %v785_v62 = vadd.f32 %v3929_v13, %v765_v63  ;;  %v651_v3 = vpop.permute.xlu0 %650 }
 0x418   :  { %v837_v60 = vmax.f32 %v835_v21, %v836_v43  ;;  %v842_v12 = vmax.f32 %v840_v4, %v841_v6  ;;  %v802_v49 = vmax.f32 %v786_v25, 0.0  ;;  %v649_v29 = vpop.permute.xlu1 %648  ;;  %v683_v46 = vadd.f32 %v3402_v27, %v651_v3 }
 0x419   :  { %v801_v47 = vmax.f32 %v785_v62, 0.0  ;;  %v682_v8 = vadd.f32 %v649_v29, %v4139_v32 }
 0x41a   :  { %v843_v22 = vrot.slane %v842_v12, 2  ;;  %v848_v26 = vsel %vm811_vm7, %v802_v49, -inf  ;;  %v2230_v37 = vsel %vm2229_vm2, %v837_v60, %v2228_v42 }
 0x41b   :  { %v847_v51 = vsel %vm809_vm6, %v801_v47, -inf  ;;  %v732_v31 = vpop.permute.xlu0 %731 }
 0x41c   :  { %v844_v28 = vmax.f32 %v842_v12, %v843_v22  ;;  %v849_v53 = vmax.f32 %v847_v51, %v848_v26  ;;  %v768_v20 = vadd.f32 %v732_v31, %v679_v7  ;;  %v730_v38 = vpop.permute.xlu1 %729 }
 0x41d   :  { %v767_v1 = vadd.f32 %v730_v38, %v678_v61 }
 0x41e   :  { %v845_v34 = vrot.slane %v844_v28, 1  ;;  %v850_v14 = vrot.slane %v849_v53, 4  ;;  %v788_v11 = vadd.f32 %v3929_v13, %v768_v20 }
 0x41f   :  { %v787_v44 = vadd.f32 %v3929_v13, %v767_v1  ;;  %v736_v35 = vpop.permute.xlu0 %735 }
 0x420   :  { %v846_v15 = vmax.f32 %v844_v28, %v845_v34  ;;  %v851_v5 = vmax.f32 %v849_v53, %v850_v14  ;;  %v804_v50 = vmax.f32 %v788_v11, 0.0  ;;  %v770_v39 = vadd.f32 %v736_v35, %v681_v33  ;;  %v734_v17 = vpop.permute.xlu1 %733 }
 0x421   :  { %v803_v24 = vmax.f32 %v787_v44, 0.0  ;;  %v769_v41 = vadd.f32 %v734_v17, %v680_v18 }
 0x422   :  { %v852_v9 = vrot.slane %v851_v5, 2  ;;  %v857_v19 = vsel %vm811_vm7, %v804_v50, -inf  ;;  %v790_v59 = vadd.f32 %v3929_v13, %v770_v39  ;;  %v2232_v2 = vsel %vm2231_vm1, %v846_v15, %v2230_v37  ;;  %v2367_v15 = vld [vmem:[#allocation2 + $0x168] sm:$0xff]  ;;  %v2585_v39 = vld [vmem:[#allocation2 + $0x150] ss:$0 sm:$0xff] }
 0x423   :  { %v856_v55 = vsel %vm809_vm6, %v803_v24, -inf  ;;  %v789_v45 = vadd.f32 %v3929_v13, %v769_v41  ;;  %v740_v52 = vpop.permute.xlu0 %739 }
 0x424   :  { %v853_v57 = vmax.f32 %v851_v5, %v852_v9  ;;  %v858_v42 = vmax.f32 %v856_v55, %v857_v19  ;;  %v806_v10 = vmax.f32 %v790_v59, 0.0  ;;  %v772_v27 = vadd.f32 %v740_v52, %v683_v46  ;;  %v738_v40 = vpop.permute.xlu1 %737  ;;  %v2368_v5 = vld [vmem:[#allocation2 + $0x170] sm:$0xff]  ;;  %v2586_v9 = vld [vmem:[#allocation2 + $0x178] ss:$0 sm:$0xff] }
 0x425   :  { %v805_v48 = vmax.f32 %v789_v45, 0.0  ;;  %v771_v16 = vadd.f32 %v738_v40, %v682_v8  ;;  %v2988_v50 = vpack.c.bf16 %v2368_v5, %v2367_v15 }
 0x426   :  { %v854_v58 = vrot.slane %v853_v57, 1  ;;  %v859_v54 = vrot.slane %v858_v42, 4  ;;  %v866_v56 = vsel %vm811_vm7, %v806_v10, -inf  ;;  %v792_v21 = vadd.f32 %v3929_v13, %v772_v27 }
 0x427   :  { %v865_v4 = vsel %vm809_vm6, %v805_v48, -inf  ;;  %v791_v30 = vadd.f32 %v3929_v13, %v771_v16  ;;  %v2262_v0 = vpop.permute.xlu0 %2261  ;;  %2989 = vmatpush3.bf16.msra.mxu1 %v2988_v50 }
 0x428   :  { %v855_v23 = vmax.f32 %v853_v57, %v854_v58  ;;  %v860_v63 = vmax.f32 %v858_v42, %v859_v54  ;;  %v867_v43 = vmax.f32 %v865_v4, %v866_v56  ;;  %v808_v6 = vmax.f32 %v792_v21, 0.0 }
 0x429   :  { %v807_v25 = vmax.f32 %v791_v30, 0.0 }
 0x42a   :  { %v861_v62 = vrot.slane %v860_v63, 2  ;;  %v868_v3 = vrot.slane %v867_v43, 4  ;;  %v875_v60 = vsel %vm811_vm7, %v808_v6, -inf  ;;  %v2234_v12 = vsel %vm2233_vm3, %v855_v23, %v2232_v2 }
 0x42b   :  { %v874_v49 = vsel %vm809_vm6, %v807_v25, -inf }
 0x42c   :  { %v862_v29 = vmax.f32 %v860_v63, %v861_v62  ;;  %v869_v47 = vmax.f32 %v867_v43, %v868_v3  ;;  %v876_v7 = vmax.f32 %v874_v49, %v875_v60 }
 0x42e   :  { %v863_v22 = vrot.slane %v862_v29, 1  ;;  %v870_v26 = vrot.slane %v869_v47, 2  ;;  %v877_v37 = vrot.slane %v876_v7, 4 }
 0x430   :  { %v864_v13 = vmax.f32 %v862_v29, %v863_v22  ;;  %v871_v36 = vmax.f32 %v869_v47, %v870_v26  ;;  %v878_v61 = vmax.f32 %v876_v7, %v877_v37 }
 0x432   :  { %v872_v51 = vrot.slane %v871_v36, 1  ;;  %v879_v31 = vrot.slane %v878_v61, 2  ;;  %v2236_v28 = vsel %vm2235_vm4, %v864_v13, %v2234_v12 }
 0x434   :  { %v880_v53 = vmax.f32 %v878_v61, %v879_v31  ;;  %v873_v20 = vmax.f32 %v871_v36, %v872_v51 }
 0x436   :  { %v881_v38 = vrot.slane %v880_v53, 1  ;;  %v2238_v1 = vsel %vm2237_vm5, %v873_v20, %v2236_v28 }
 0x438   :  { %v882_v34 = vmax.f32 %v880_v53, %v881_v38 }
 0x43a   :  { %v2240_v33 = vsel %vm2239_vm8, %v882_v34, %v2238_v1 }
 0x473   :  { %v2258_v14 = vpop.permute.xlu1 %2257 }
 0x474   :  { %v2268_v11 = vsel %vm809_vm6, %v2240_v33, %v2258_v14 }
 0x475   :  { %v2270_v44 = vsel %vm2269_vm9, %v2268_v11, %v2262_v0 }
 0x477   :  { %v2266_v18 = vpop.permute.xlu1 %2265 }
 0x478   :  { %v2272_v35 = vsel %vm2271_vm10, %v2270_v44, %v2266_v18 }
 0x479   :  { %2892 = vmatmul.mubr.f32.vlgmr.msra.gmra.mrb[48].mxu0 %v2272_v35 }
 0x54c   :  { %v2360_v17 = vpop.f32.mrb[48].mxu0 }
 0x54d   :  { %v2361_v46 = vadd.f32 %v2585_v39, %v2360_v17  ;;  %v2893_v24 = vpop.f32.mrb[49].mxu0 }
 0x54f   :  { %v2364_v41 = vmax.f32 %v2361_v46, 0.0 }
 0x551   :  { %2903 = vmatmul.mubr.msk.f32.vlgmr.msra.gmra.mrb[52].mxu1 %vm809_vm6, %v2364_v41 }
 0x624   :  { %v2443_v19 = vpop.f32.mrb[52].mxu1 }
 0x625   :  { %v2444_v59 = vadd.f32 %v2586_v9, %v2443_v19  ;;  %v2904_v2 = vpop.f32.mrb[53].mxu1 }
 0x627   :  { %2447 = vst [vmem:[#allocation5] sm:$0xff] %v2444_v59 }
 0x628   :  { %3039 = shalt.err (!%p3036_p12)
}
 0x629   :  { %s3040_s18 = scalar_lea.hbm %s4010_s6, 128 }
 0x62a   :  { %p3041_p13 = scmp.ne.s32.totalorder %s4010_s6, %s3040_s18  ;;  %p3044_p0 = scmp.lt.u32.totalorder %s3040_s18, %s4010_s6 }
 0x62c   :  { %p3046_p1 = pnand %p3044_p0, %p3041_p13 }
 0x62e   :  { %3049 = shalt.err (!%p3046_p1)
}
 0x62f   :  { %2457 = dma.vmem_to_hbm [thread:$0]  %s2455_s14, 128, %s4010_s6, [#allocation4]  }
 0x630   :  { %3052 = dma.done.wait [#allocation4], 128  }
 0x631   :  { %3053 = vsyncadd [#allocation4], 4294967168 }
 0x632   :  { %2461 = vsyncpa [#allocation3], 1 }
 0x633   :  { %2462 = vsyncpa [#allocation4], 1 }

</bundles_post_ra>
